<compile_context>
chip_gen: v7x
topology: tpu7x:2x2x1
jax: 0.10.0
libtpu: 0.0.40
codegen_flags: <defaults>
</compile_context>

<pallas_src>
import jax
import jax.numpy as jnp
from jax.experimental import pallas as pl
from jax.experimental.pallas import tpu as pltpu

# ---- model sizes (small, consistent with the module) -----------------------
HIDDEN = 32     # hidden_size
VOCAB = 64      # embedding rows
SEQ = 8         # max input length L
BATCH = 2
N_LAYERS = 1    # TODO(synk): n_layers > 1 (stacked bi-GRU + inter-layer dropout) not implemented.


def _encoder_kernel(ids_ref, len_ref, h0_ref, emb_ref, w_ref, b_ref,
                    out_ref, hid_ref):
    """Bidirectional GRU encoder, whole sequence per kernel invocation.

    ids_ref : (L*B, 1) int32   token ids, time-major, flattened
    len_ref : (B, 1)   int32   sequence lengths
    h0_ref  : (2, B, H) f32    initial hidden [fwd, bwd]
    emb_ref : (V, H)   f32     embedding table (resident in VMEM)
    w_ref   : (4H, 8H) f32     fused block-diagonal GRU weights (both directions)
    b_ref   : (1, 8H)  f32     fused biases [r, z, i_n, h_n] x {fwd, bwd}
    out_ref : (L, B, H) f32    fwd + bwd outputs, zero past each length
    hid_ref : (2, B, H) f32    final hidden [fwd, bwd]
    """
    L, B, H = out_ref.shape
    V = emb_ref.shape[0]

    # ---- embedding gather as a single one-hot MXU matmul --------------------
    ids = ids_ref[...]                                            # (L*B, 1)
    iota = jax.lax.broadcasted_iota(jnp.int32, (L * B, V), 1)
    onehot = (iota == ids).astype(jnp.float32)                    # (L*B, V)
    emb = jnp.dot(onehot, emb_ref[...],
                  preferred_element_type=jnp.float32)             # (L*B, H)

    lengths = len_ref[...]                                        # (B, 1) int32
    h_f = h0_ref[0]                                               # (B, H)
    h_b = h0_ref[1]                                               # (B, H)

    outs_f = [None] * L
    outs_b = [None] * L

    # Fully unrolled time loop: step i advances the forward direction at t = i
    # and the backward direction at t = L-1-i, sharing ONE fused matmul.
    for i in range(L):
        t_b = L - 1 - i
        x_f = emb[i * B:(i + 1) * B, :]                           # (B, H)
        x_b = emb[t_b * B:(t_b + 1) * B, :]                       # (B, H)

        u = jnp.concatenate([x_f, h_f, x_b, h_b], axis=1)         # (B, 4H) = (B, 128)
        g = jnp.dot(u, w_ref[...],
                    preferred_element_type=jnp.float32) + b_ref[...]   # (B, 8H)

        # forward GRU cell (PyTorch gate order r, z, n)
        r_f = jax.nn.sigmoid(g[:, 0 * H:1 * H])
        z_f = jax.nn.sigmoid(g[:, 1 * H:2 * H])
        n_f = jnp.tanh(g[:, 2 * H:3 * H] + r_f * g[:, 3 * H:4 * H])
        hf_new = (1.0 - z_f) * n_f + z_f * h_f

        # backward GRU cell
        r_b = jax.nn.sigmoid(g[:, 4 * H:5 * H])
        z_b = jax.nn.sigmoid(g[:, 5 * H:6 * H])
        n_b = jnp.tanh(g[:, 6 * H:7 * H] + r_b * g[:, 7 * H:8 * H])
        hb_new = (1.0 - z_b) * n_b + z_b * h_b

        # packed-sequence masking: only update state / emit while t < length
        m_f = (i < lengths).astype(jnp.float32)                   # (B, 1)
        m_b = (t_b < lengths).astype(jnp.float32)                 # (B, 1)
        h_f = m_f * hf_new + (1.0 - m_f) * h_f
        h_b = m_b * hb_new + (1.0 - m_b) * h_b
        outs_f[i] = m_f * hf_new
        outs_b[t_b] = m_b * hb_new

    # outputs = fwd + bwd (equivalent to out[..., :H] + out[..., H:])
    for t in range(L):
        out_ref[t] = outs_f[t] + outs_b[t]
    hid_ref[0] = h_f
    hid_ref[1] = h_b


# ---------------------------- wrapper / plumbing -----------------------------

def _fuse_direction(w_ih, w_hh, b_ih, b_hh):
    """Merge W_ih/W_hh of one GRU direction into a (2H, 4H) weight + (4H,) bias.

    Columns: [r | z | gi_n | gh_n]; rows: [x-part (H) ; h-part (H)].
    """
    H = w_ih.shape[1]
    z = jnp.zeros((H, H), jnp.float32)
    top = jnp.concatenate([w_ih[:H].T, w_ih[H:2 * H].T, w_ih[2 * H:].T, z], axis=1)
    bot = jnp.concatenate([w_hh[:H].T, w_hh[H:2 * H].T, z, w_hh[2 * H:].T], axis=1)
    w = jnp.concatenate([top, bot], axis=0)                       # (2H, 4H)
    b = jnp.concatenate([b_ih[:H] + b_hh[:H],
                         b_ih[H:2 * H] + b_hh[H:2 * H],
                         b_ih[2 * H:], b_hh[2 * H:]])             # (4H,)
    return w.astype(jnp.float32), b.astype(jnp.float32)


def _build_fused_weights(params):
    """Block-diagonal packing of the two directions: (4H, 8H) weight, (1, 8H) bias."""
    wf, bf = _fuse_direction(params["w_ih_f"], params["w_hh_f"],
                             params["b_ih_f"], params["b_hh_f"])
    wb, bb = _fuse_direction(params["w_ih_b"], params["w_hh_b"],
                             params["b_ih_b"], params["b_hh_b"])
    z = jnp.zeros_like(wf)
    w_big = jnp.concatenate([jnp.concatenate([wf, z], axis=1),
                             jnp.concatenate([z, wb], axis=1)], axis=0)   # (4H, 8H)
    b_big = jnp.concatenate([bf, bb]).reshape(1, -1)                       # (1, 8H)
    return w_big, b_big


def encoder_rnn_forward(input_seq, input_lengths, params, hidden=None):
    """EncoderRNN.forward equivalent.

    input_seq     : (L, B) int32 token ids
    input_lengths : (B,)   int32 true sequence lengths
    hidden        : optional (2, B, H) f32 initial hidden (defaults to zeros)
    returns (outputs (L, B, H), hidden (2, B, H))
    """
    L, B = input_seq.shape
    H = params["w_ih_f"].shape[1]
    if hidden is None:
        hidden = jnp.zeros((2, B, H), jnp.float32)

    # One-time (per call) weight fusion + layout plumbing.
    w_big, b_big = _build_fused_weights(params)
    ids = input_seq.reshape(L * B, 1).astype(jnp.int32)
    lens = input_lengths.reshape(B, 1).astype(jnp.int32)

    vmem = pl.BlockSpec(memory_space=pltpu.MemorySpace.VMEM)
    outputs, hid = pl.pallas_call(
        _encoder_kernel,
        out_shape=(jax.ShapeDtypeStruct((L, B, H), jnp.float32),
                   jax.ShapeDtypeStruct((2, B, H), jnp.float32)),
        in_specs=[vmem] * 6,
        out_specs=(vmem, vmem),
    )(
        ids,
        lens,
        hidden.astype(jnp.float32),
        params["emb_table"].astype(jnp.float32),
        w_big,
        b_big,
    )
    return outputs, hid


# ---------------------------- pure-JAX reference -----------------------------

def _gru_cell_ref(x, h, w_ih, w_hh, b_ih, b_hh):
    H = h.shape[1]
    gi = x @ w_ih.T + b_ih
    gh = h @ w_hh.T + b_hh
    r = jax.nn.sigmoid(gi[:, :H] + gh[:, :H])
    z = jax.nn.sigmoid(gi[:, H:2 * H] + gh[:, H:2 * H])
    n = jnp.tanh(gi[:, 2 * H:] + r * gh[:, 2 * H:])
    return (1.0 - z) * n + z * h


def _reference_encoder(input_seq, input_lengths, params, hidden=None):
    """Mirrors PyTorch bidirectional GRU + pack/pad_packed_sequence semantics."""
    L, B = input_seq.shape
    H = params["w_ih_f"].shape[1]
    if hidden is None:
        hidden = jnp.zeros((2, B, H), jnp.float32)
    emb = params["emb_table"][input_seq]                          # (L, B, H)
    lens = input_lengths.reshape(B, 1)
    h_f, h_b = hidden[0], hidden[1]
    outs_f, outs_b = [], [None] * L
    for t in range(L):
        hn = _gru_cell_ref(emb[t], h_f, params["w_ih_f"], params["w_hh_f"],
                           params["b_ih_f"], params["b_hh_f"])
        m = (t < lens).astype(jnp.float32)
        h_f = m * hn + (1.0 - m) * h_f
        outs_f.append(m * hn)
    for t in range(L - 1, -1, -1):
        hn = _gru_cell_ref(emb[t], h_b, params["w_ih_b"], params["w_hh_b"],
                           params["b_ih_b"], params["b_hh_b"])
        m = (t < lens).astype(jnp.float32)
        h_b = m * hn + (1.0 - m) * h_b
        outs_b[t] = m * hn
    outputs = jnp.stack(outs_f, axis=0) + jnp.stack(outs_b, axis=0)
    return outputs, jnp.stack([h_f, h_b], axis=0)


def init_params(key, hidden=HIDDEN, vocab=VOCAB):
    """PyTorch-style uniform(-1/sqrt(H), 1/sqrt(H)) GRU init; normal embedding."""
    ks = jax.random.split(key, 9)
    bound = 1.0 / jnp.sqrt(hidden)
    u = lambda k, shape: jax.random.uniform(k, shape, jnp.float32, -bound, bound)
    return {
        "emb_table": jax.random.normal(ks[0], (vocab, hidden), jnp.float32),
        # forward direction
        "w_ih_f": u(ks[1], (3 * hidden, hidden)),
        "w_hh_f": u(ks[2], (3 * hidden, hidden)),
        "b_ih_f": u(ks[3], (3 * hidden,)),
        "b_hh_f": u(ks[4], (3 * hidden,)),
        # backward direction
        "w_ih_b": u(ks[5], (3 * hidden, hidden)),
        "w_hh_b": u(ks[6], (3 * hidden, hidden)),
        "b_ih_b": u(ks[7], (3 * hidden,)),
        "b_hh_b": u(ks[8], (3 * hidden,)),
    }


if __name__ == "__main__":
    key = jax.random.PRNGKey(0)
    kp, ki = jax.random.split(key, 2)

    params = init_params(kp)
    input_seq = jax.random.randint(ki, (SEQ, BATCH), 0, VOCAB, dtype=jnp.int32)
    # lengths sorted descending, as pack_padded_sequence expects
    input_lengths = jnp.array([SEQ, 5], dtype=jnp.int32)

    outputs, hid = encoder_rnn_forward(input_seq, input_lengths, params)
    jax.block_until_ready((outputs, hid))

    out_ref, hid_ref = _reference_encoder(input_seq, input_lengths, params)
    assert outputs.shape == (SEQ, BATCH, HIDDEN)
    assert hid.shape == (2 * N_LAYERS, BATCH, HIDDEN)
    assert jnp.allclose(outputs, out_ref, atol=1e-5, rtol=1e-5)
    assert jnp.allclose(hid, hid_ref, atol=1e-5, rtol=1e-5)
    # padded positions must be exactly zero (pad_packed_sequence semantics)
    assert jnp.allclose(outputs[5:, 1, :], 0.0)
    print("KERNEL_OK")
</pallas_src>

<mosaic_0001>
module attributes {stable_mosaic.version = 11 : i64} {
  func.func @_encoder_kernel(%arg0: memref<16x1xi32, #tpu.memory_space<vmem>>, %arg1: memref<2x1xi32, #tpu.memory_space<vmem>>, %arg2: memref<2x2x32xf32, #tpu.memory_space<vmem>>, %arg3: memref<64x32xf32, #tpu.memory_space<vmem>>, %arg4: memref<128x256xf32, #tpu.memory_space<vmem>>, %arg5: memref<1x256xf32, #tpu.memory_space<vmem>>, %arg6: memref<8x2x32xf32, #tpu.memory_space<vmem>>, %arg7: memref<2x2x32xf32, #tpu.memory_space<vmem>>) attributes {dimension_semantics = [], scalar_prefetch = 0 : i64, scratch_operands = 0 : i64, tpu.core_type = #tpu.core_type<tc>} {
    %c0 = arith.constant 0 : index
    %c0_0 = arith.constant 0 : index
    %0 = vector.load %arg0[%c0, %c0_0] : memref<16x1xi32, #tpu.memory_space<vmem>>, vector<16x1xi32>
    %1 = tpu.iota {dimensions = array<i32: 1>} : vector<16x64xi32>
    %2 = vector.broadcast %0 : vector<16x1xi32> to vector<16x64xi32>
    %3 = arith.cmpi eq, %1, %2 : vector<16x64xi32>
    %4 = arith.extui %3 : vector<16x64xi1> to vector<16x64xi32>
    %5 = arith.sitofp %4 : vector<16x64xi32> to vector<16x64xf32>
    %c0_1 = arith.constant 0 : index
    %c0_2 = arith.constant 0 : index
    %6 = vector.load %arg3[%c0_1, %c0_2] : memref<64x32xf32, #tpu.memory_space<vmem>>, vector<64x32xf32>
    %cst = arith.constant dense<0.000000e+00> : vector<16x32xf32>
    %7 = tpu.matmul %5, %6, %cst {dimension_numbers = #tpu.dot_dimension_numbers<[1], [0], [0], [1], [0, 0, 1, 1], [], []>} : vector<16x64xf32>, vector<64x32xf32>, vector<16x32xf32> -> vector<16x32xf32>
    %c0_3 = arith.constant 0 : index
    %c0_4 = arith.constant 0 : index
    %8 = vector.load %arg1[%c0_3, %c0_4] : memref<2x1xi32, #tpu.memory_space<vmem>>, vector<2x1xi32>
    %c0_5 = arith.constant 0 : index
    %c0_6 = arith.constant 0 : index
    %c0_7 = arith.constant 0 : index
    %9 = vector.load %arg2[%c0_5, %c0_6, %c0_7] : memref<2x2x32xf32, #tpu.memory_space<vmem>>, vector<1x2x32xf32>
    %10 = vector.shape_cast %9 : vector<1x2x32xf32> to vector<2x32xf32>
    %c1 = arith.constant 1 : index
    %c0_8 = arith.constant 0 : index
    %c0_9 = arith.constant 0 : index
    %11 = vector.load %arg2[%c1, %c0_8, %c0_9] : memref<2x2x32xf32, #tpu.memory_space<vmem>>, vector<1x2x32xf32>
    %12 = vector.shape_cast %11 : vector<1x2x32xf32> to vector<2x32xf32>
    %13 = vector.extract_strided_slice %7 {offsets = [0, 0], sizes = [2, 32], strides = [1, 1]} : vector<16x32xf32> to vector<2x32xf32>
    %14 = vector.extract_strided_slice %7 {offsets = [14, 0], sizes = [2, 32], strides = [1, 1]} : vector<16x32xf32> to vector<2x32xf32>
    %15 = tpu.concatenate %13, %10, %14, %12 in 1 : vector<2x32xf32>, vector<2x32xf32>, vector<2x32xf32>, vector<2x32xf32> -> vector<2x128xf32>
    %c0_10 = arith.constant 0 : index
    %c0_11 = arith.constant 0 : index
    %16 = vector.load %arg4[%c0_10, %c0_11] : memref<128x256xf32, #tpu.memory_space<vmem>>, vector<128x256xf32>
    %cst_12 = arith.constant dense<0.000000e+00> : vector<2x256xf32>
    %17 = tpu.matmul %15, %16, %cst_12 {dimension_numbers = #tpu.dot_dimension_numbers<[1], [0], [0], [1], [0, 0, 1, 1], [], []>} : vector<2x128xf32>, vector<128x256xf32>, vector<2x256xf32> -> vector<2x256xf32>
    %c0_13 = arith.constant 0 : index
    %c0_14 = arith.constant 0 : index
    %18 = vector.load %arg5[%c0_13, %c0_14] : memref<1x256xf32, #tpu.memory_space<vmem>>, vector<1x256xf32>
    %19 = vector.broadcast %18 : vector<1x256xf32> to vector<2x256xf32>
    %20 = arith.addf %17, %19 : vector<2x256xf32>
    %21 = vector.extract_strided_slice %20 {offsets = [0, 0], sizes = [2, 32], strides = [1, 1]} : vector<2x256xf32> to vector<2x32xf32>
    %22 = arith.negf %21 : vector<2x32xf32>
    %23 = math.exp %22 : vector<2x32xf32>
    %cst_15 = arith.constant 1.000000e+00 : f32
    %24 = vector.broadcast %cst_15 : f32 to vector<2x32xf32>
    %25 = arith.addf %24, %23 : vector<2x32xf32>
    %26 = arith.divf %24, %25 : vector<2x32xf32>
    %27 = vector.extract_strided_slice %20 {offsets = [0, 32], sizes = [2, 32], strides = [1, 1]} : vector<2x256xf32> to vector<2x32xf32>
    %28 = arith.negf %27 : vector<2x32xf32>
    %29 = math.exp %28 : vector<2x32xf32>
    %cst_16 = arith.constant 1.000000e+00 : f32
    %30 = vector.broadcast %cst_16 : f32 to vector<2x32xf32>
    %31 = arith.addf %30, %29 : vector<2x32xf32>
    %32 = arith.divf %30, %31 : vector<2x32xf32>
    %33 = vector.extract_strided_slice %20 {offsets = [0, 64], sizes = [2, 32], strides = [1, 1]} : vector<2x256xf32> to vector<2x32xf32>
    %34 = vector.extract_strided_slice %20 {offsets = [0, 96], sizes = [2, 32], strides = [1, 1]} : vector<2x256xf32> to vector<2x32xf32>
    %35 = arith.mulf %26, %34 : vector<2x32xf32>
    %36 = arith.addf %33, %35 : vector<2x32xf32>
    %37 = math.tanh %36 : vector<2x32xf32>
    %cst_17 = arith.constant 1.000000e+00 : f32
    %38 = vector.broadcast %cst_17 : f32 to vector<2x32xf32>
    %39 = arith.subf %38, %32 : vector<2x32xf32>
    %40 = arith.mulf %39, %37 : vector<2x32xf32>
    %41 = arith.mulf %32, %10 : vector<2x32xf32>
    %42 = arith.addf %40, %41 : vector<2x32xf32>
    %43 = vector.extract_strided_slice %20 {offsets = [0, 128], sizes = [2, 32], strides = [1, 1]} : vector<2x256xf32> to vector<2x32xf32>
    %44 = arith.negf %43 : vector<2x32xf32>
    %45 = math.exp %44 : vector<2x32xf32>
    %cst_18 = arith.constant 1.000000e+00 : f32
    %46 = vector.broadcast %cst_18 : f32 to vector<2x32xf32>
    %47 = arith.addf %46, %45 : vector<2x32xf32>
    %48 = arith.divf %46, %47 : vector<2x32xf32>
    %49 = vector.extract_strided_slice %20 {offsets = [0, 160], sizes = [2, 32], strides = [1, 1]} : vector<2x256xf32> to vector<2x32xf32>
    %50 = arith.negf %49 : vector<2x32xf32>
    %51 = math.exp %50 : vector<2x32xf32>
    %cst_19 = arith.constant 1.000000e+00 : f32
    %52 = vector.broadcast %cst_19 : f32 to vector<2x32xf32>
    %53 = arith.addf %52, %51 : vector<2x32xf32>
    %54 = arith.divf %52, %53 : vector<2x32xf32>
    %55 = vector.extract_strided_slice %20 {offsets = [0, 192], sizes = [2, 32], strides = [1, 1]} : vector<2x256xf32> to vector<2x32xf32>
    %56 = vector.extract_strided_slice %20 {offsets = [0, 224], sizes = [2, 32], strides = [1, 1]} : vector<2x256xf32> to vector<2x32xf32>
    %57 = arith.mulf %48, %56 : vector<2x32xf32>
    %58 = arith.addf %55, %57 : vector<2x32xf32>
    %59 = math.tanh %58 : vector<2x32xf32>
    %cst_20 = arith.constant 1.000000e+00 : f32
    %60 = vector.broadcast %cst_20 : f32 to vector<2x32xf32>
    %61 = arith.subf %60, %54 : vector<2x32xf32>
    %62 = arith.mulf %61, %59 : vector<2x32xf32>
    %63 = arith.mulf %54, %12 : vector<2x32xf32>
    %64 = arith.addf %62, %63 : vector<2x32xf32>
    %c0_i32 = arith.constant 0 : i32
    %65 = vector.broadcast %c0_i32 : i32 to vector<2x1xi32>
    %66 = arith.cmpi sgt, %8, %65 : vector<2x1xi32>
    %67 = arith.extui %66 : vector<2x1xi1> to vector<2x1xi32>
    %68 = arith.sitofp %67 : vector<2x1xi32> to vector<2x1xf32>
    %c7_i32 = arith.constant 7 : i32
    %69 = vector.broadcast %c7_i32 : i32 to vector<2x1xi32>
    %70 = arith.cmpi sgt, %8, %69 : vector<2x1xi32>
    %71 = arith.extui %70 : vector<2x1xi1> to vector<2x1xi32>
    %72 = arith.sitofp %71 : vector<2x1xi32> to vector<2x1xf32>
    %73 = vector.broadcast %68 : vector<2x1xf32> to vector<2x32xf32>
    %74 = arith.mulf %73, %42 : vector<2x32xf32>
    %cst_21 = arith.constant 1.000000e+00 : f32
    %75 = vector.broadcast %cst_21 : f32 to vector<2x1xf32>
    %76 = arith.subf %75, %68 : vector<2x1xf32>
    %77 = vector.broadcast %76 : vector<2x1xf32> to vector<2x32xf32>
    %78 = arith.mulf %77, %10 : vector<2x32xf32>
    %79 = arith.addf %74, %78 : vector<2x32xf32>
    %80 = vector.broadcast %72 : vector<2x1xf32> to vector<2x32xf32>
    %81 = arith.mulf %80, %64 : vector<2x32xf32>
    %cst_22 = arith.constant 1.000000e+00 : f32
    %82 = vector.broadcast %cst_22 : f32 to vector<2x1xf32>
    %83 = arith.subf %82, %72 : vector<2x1xf32>
    %84 = vector.broadcast %83 : vector<2x1xf32> to vector<2x32xf32>
    %85 = arith.mulf %84, %12 : vector<2x32xf32>
    %86 = arith.addf %81, %85 : vector<2x32xf32>
    %87 = vector.broadcast %68 : vector<2x1xf32> to vector<2x32xf32>
    %88 = arith.mulf %87, %42 : vector<2x32xf32>
    %89 = vector.broadcast %72 : vector<2x1xf32> to vector<2x32xf32>
    %90 = arith.mulf %89, %64 : vector<2x32xf32>
    %91 = vector.extract_strided_slice %7 {offsets = [2, 0], sizes = [2, 32], strides = [1, 1]} : vector<16x32xf32> to vector<2x32xf32>
    %92 = vector.extract_strided_slice %7 {offsets = [12, 0], sizes = [2, 32], strides = [1, 1]} : vector<16x32xf32> to vector<2x32xf32>
    %93 = tpu.concatenate %91, %79, %92, %86 in 1 : vector<2x32xf32>, vector<2x32xf32>, vector<2x32xf32>, vector<2x32xf32> -> vector<2x128xf32>
    %c0_23 = arith.constant 0 : index
    %c0_24 = arith.constant 0 : index
    %94 = vector.load %arg4[%c0_23, %c0_24] : memref<128x256xf32, #tpu.memory_space<vmem>>, vector<128x256xf32>
    %cst_25 = arith.constant dense<0.000000e+00> : vector<2x256xf32>
    %95 = tpu.matmul %93, %94, %cst_25 {dimension_numbers = #tpu.dot_dimension_numbers<[1], [0], [0], [1], [0, 0, 1, 1], [], []>} : vector<2x128xf32>, vector<128x256xf32>, vector<2x256xf32> -> vector<2x256xf32>
    %c0_26 = arith.constant 0 : index
    %c0_27 = arith.constant 0 : index
    %96 = vector.load %arg5[%c0_26, %c0_27] : memref<1x256xf32, #tpu.memory_space<vmem>>, vector<1x256xf32>
    %97 = vector.broadcast %96 : vector<1x256xf32> to vector<2x256xf32>
    %98 = arith.addf %95, %97 : vector<2x256xf32>
    %99 = vector.extract_strided_slice %98 {offsets = [0, 0], sizes = [2, 32], strides = [1, 1]} : vector<2x256xf32> to vector<2x32xf32>
    %100 = arith.negf %99 : vector<2x32xf32>
    %101 = math.exp %100 : vector<2x32xf32>
    %cst_28 = arith.constant 1.000000e+00 : f32
    %102 = vector.broadcast %cst_28 : f32 to vector<2x32xf32>
    %103 = arith.addf %102, %101 : vector<2x32xf32>
    %104 = arith.divf %102, %103 : vector<2x32xf32>
    %105 = vector.extract_strided_slice %98 {offsets = [0, 32], sizes = [2, 32], strides = [1, 1]} : vector<2x256xf32> to vector<2x32xf32>
    %106 = arith.negf %105 : vector<2x32xf32>
    %107 = math.exp %106 : vector<2x32xf32>
    %cst_29 = arith.constant 1.000000e+00 : f32
    %108 = vector.broadcast %cst_29 : f32 to vector<2x32xf32>
    %109 = arith.addf %108, %107 : vector<2x32xf32>
    %110 = arith.divf %108, %109 : vector<2x32xf32>
    %111 = vector.extract_strided_slice %98 {offsets = [0, 64], sizes = [2, 32], strides = [1, 1]} : vector<2x256xf32> to vector<2x32xf32>
    %112 = vector.extract_strided_slice %98 {offsets = [0, 96], sizes = [2, 32], strides = [1, 1]} : vector<2x256xf32> to vector<2x32xf32>
    %113 = arith.mulf %104, %112 : vector<2x32xf32>
    %114 = arith.addf %111, %113 : vector<2x32xf32>
    %115 = math.tanh %114 : vector<2x32xf32>
    %cst_30 = arith.constant 1.000000e+00 : f32
    %116 = vector.broadcast %cst_30 : f32 to vector<2x32xf32>
    %117 = arith.subf %116, %110 : vector<2x32xf32>
    %118 = arith.mulf %117, %115 : vector<2x32xf32>
    %119 = arith.mulf %110, %79 : vector<2x32xf32>
    %120 = arith.addf %118, %119 : vector<2x32xf32>
    %121 = vector.extract_strided_slice %98 {offsets = [0, 128], sizes = [2, 32], strides = [1, 1]} : vector<2x256xf32> to vector<2x32xf32>
    %122 = arith.negf %121 : vector<2x32xf32>
    %123 = math.exp %122 : vector<2x32xf32>
    %cst_31 = arith.constant 1.000000e+00 : f32
    %124 = vector.broadcast %cst_31 : f32 to vector<2x32xf32>
    %125 = arith.addf %124, %123 : vector<2x32xf32>
    %126 = arith.divf %124, %125 : vector<2x32xf32>
    %127 = vector.extract_strided_slice %98 {offsets = [0, 160], sizes = [2, 32], strides = [1, 1]} : vector<2x256xf32> to vector<2x32xf32>
    %128 = arith.negf %127 : vector<2x32xf32>
    %129 = math.exp %128 : vector<2x32xf32>
    %cst_32 = arith.constant 1.000000e+00 : f32
    %130 = vector.broadcast %cst_32 : f32 to vector<2x32xf32>
    %131 = arith.addf %130, %129 : vector<2x32xf32>
    %132 = arith.divf %130, %131 : vector<2x32xf32>
    %133 = vector.extract_strided_slice %98 {offsets = [0, 192], sizes = [2, 32], strides = [1, 1]} : vector<2x256xf32> to vector<2x32xf32>
    %134 = vector.extract_strided_slice %98 {offsets = [0, 224], sizes = [2, 32], strides = [1, 1]} : vector<2x256xf32> to vector<2x32xf32>
    %135 = arith.mulf %126, %134 : vector<2x32xf32>
    %136 = arith.addf %133, %135 : vector<2x32xf32>
    %137 = math.tanh %136 : vector<2x32xf32>
    %cst_33 = arith.constant 1.000000e+00 : f32
    %138 = vector.broadcast %cst_33 : f32 to vector<2x32xf32>
    %139 = arith.subf %138, %132 : vector<2x32xf32>
    %140 = arith.mulf %139, %137 : vector<2x32xf32>
    %141 = arith.mulf %132, %86 : vector<2x32xf32>
    %142 = arith.addf %140, %141 : vector<2x32xf32>
    %c1_i32 = arith.constant 1 : i32
    %143 = vector.broadcast %c1_i32 : i32 to vector<2x1xi32>
    %144 = arith.cmpi sgt, %8, %143 : vector<2x1xi32>
    %145 = arith.extui %144 : vector<2x1xi1> to vector<2x1xi32>
    %146 = arith.sitofp %145 : vector<2x1xi32> to vector<2x1xf32>
    %c6_i32 = arith.constant 6 : i32
    %147 = vector.broadcast %c6_i32 : i32 to vector<2x1xi32>
    %148 = arith.cmpi sgt, %8, %147 : vector<2x1xi32>
    %149 = arith.extui %148 : vector<2x1xi1> to vector<2x1xi32>
    %150 = arith.sitofp %149 : vector<2x1xi32> to vector<2x1xf32>
    %151 = vector.broadcast %146 : vector<2x1xf32> to vector<2x32xf32>
    %152 = arith.mulf %151, %120 : vector<2x32xf32>
    %cst_34 = arith.constant 1.000000e+00 : f32
    %153 = vector.broadcast %cst_34 : f32 to vector<2x1xf32>
    %154 = arith.subf %153, %146 : vector<2x1xf32>
    %155 = vector.broadcast %154 : vector<2x1xf32> to vector<2x32xf32>
    %156 = arith.mulf %155, %79 : vector<2x32xf32>
    %157 = arith.addf %152, %156 : vector<2x32xf32>
    %158 = vector.broadcast %150 : vector<2x1xf32> to vector<2x32xf32>
    %159 = arith.mulf %158, %142 : vector<2x32xf32>
    %cst_35 = arith.constant 1.000000e+00 : f32
    %160 = vector.broadcast %cst_35 : f32 to vector<2x1xf32>
    %161 = arith.subf %160, %150 : vector<2x1xf32>
    %162 = vector.broadcast %161 : vector<2x1xf32> to vector<2x32xf32>
    %163 = arith.mulf %162, %86 : vector<2x32xf32>
    %164 = arith.addf %159, %163 : vector<2x32xf32>
    %165 = vector.broadcast %146 : vector<2x1xf32> to vector<2x32xf32>
    %166 = arith.mulf %165, %120 : vector<2x32xf32>
    %167 = vector.broadcast %150 : vector<2x1xf32> to vector<2x32xf32>
    %168 = arith.mulf %167, %142 : vector<2x32xf32>
    %169 = vector.extract_strided_slice %7 {offsets = [4, 0], sizes = [2, 32], strides = [1, 1]} : vector<16x32xf32> to vector<2x32xf32>
    %170 = vector.extract_strided_slice %7 {offsets = [10, 0], sizes = [2, 32], strides = [1, 1]} : vector<16x32xf32> to vector<2x32xf32>
    %171 = tpu.concatenate %169, %157, %170, %164 in 1 : vector<2x32xf32>, vector<2x32xf32>, vector<2x32xf32>, vector<2x32xf32> -> vector<2x128xf32>
    %c0_36 = arith.constant 0 : index
    %c0_37 = arith.constant 0 : index
    %172 = vector.load %arg4[%c0_36, %c0_37] : memref<128x256xf32, #tpu.memory_space<vmem>>, vector<128x256xf32>
    %cst_38 = arith.constant dense<0.000000e+00> : vector<2x256xf32>
    %173 = tpu.matmul %171, %172, %cst_38 {dimension_numbers = #tpu.dot_dimension_numbers<[1], [0], [0], [1], [0, 0, 1, 1], [], []>} : vector<2x128xf32>, vector<128x256xf32>, vector<2x256xf32> -> vector<2x256xf32>
    %c0_39 = arith.constant 0 : index
    %c0_40 = arith.constant 0 : index
    %174 = vector.load %arg5[%c0_39, %c0_40] : memref<1x256xf32, #tpu.memory_space<vmem>>, vector<1x256xf32>
    %175 = vector.broadcast %174 : vector<1x256xf32> to vector<2x256xf32>
    %176 = arith.addf %173, %175 : vector<2x256xf32>
    %177 = vector.extract_strided_slice %176 {offsets = [0, 0], sizes = [2, 32], strides = [1, 1]} : vector<2x256xf32> to vector<2x32xf32>
    %178 = arith.negf %177 : vector<2x32xf32>
    %179 = math.exp %178 : vector<2x32xf32>
    %cst_41 = arith.constant 1.000000e+00 : f32
    %180 = vector.broadcast %cst_41 : f32 to vector<2x32xf32>
    %181 = arith.addf %180, %179 : vector<2x32xf32>
    %182 = arith.divf %180, %181 : vector<2x32xf32>
    %183 = vector.extract_strided_slice %176 {offsets = [0, 32], sizes = [2, 32], strides = [1, 1]} : vector<2x256xf32> to vector<2x32xf32>
    %184 = arith.negf %183 : vector<2x32xf32>
    %185 = math.exp %184 : vector<2x32xf32>
    %cst_42 = arith.constant 1.000000e+00 : f32
    %186 = vector.broadcast %cst_42 : f32 to vector<2x32xf32>
    %187 = arith.addf %186, %185 : vector<2x32xf32>
    %188 = arith.divf %186, %187 : vector<2x32xf32>
    %189 = vector.extract_strided_slice %176 {offsets = [0, 64], sizes = [2, 32], strides = [1, 1]} : vector<2x256xf32> to vector<2x32xf32>
    %190 = vector.extract_strided_slice %176 {offsets = [0, 96], sizes = [2, 32], strides = [1, 1]} : vector<2x256xf32> to vector<2x32xf32>
    %191 = arith.mulf %182, %190 : vector<2x32xf32>
    %192 = arith.addf %189, %191 : vector<2x32xf32>
    %193 = math.tanh %192 : vector<2x32xf32>
    %cst_43 = arith.constant 1.000000e+00 : f32
    %194 = vector.broadcast %cst_43 : f32 to vector<2x32xf32>
    %195 = arith.subf %194, %188 : vector<2x32xf32>
    %196 = arith.mulf %195, %193 : vector<2x32xf32>
    %197 = arith.mulf %188, %157 : vector<2x32xf32>
    %198 = arith.addf %196, %197 : vector<2x32xf32>
    %199 = vector.extract_strided_slice %176 {offsets = [0, 128], sizes = [2, 32], strides = [1, 1]} : vector<2x256xf32> to vector<2x32xf32>
    %200 = arith.negf %199 : vector<2x32xf32>
    %201 = math.exp %200 : vector<2x32xf32>
    %cst_44 = arith.constant 1.000000e+00 : f32
    %202 = vector.broadcast %cst_44 : f32 to vector<2x32xf32>
    %203 = arith.addf %202, %201 : vector<2x32xf32>
    %204 = arith.divf %202, %203 : vector<2x32xf32>
    %205 = vector.extract_strided_slice %176 {offsets = [0, 160], sizes = [2, 32], strides = [1, 1]} : vector<2x256xf32> to vector<2x32xf32>
    %206 = arith.negf %205 : vector<2x32xf32>
    %207 = math.exp %206 : vector<2x32xf32>
    %cst_45 = arith.constant 1.000000e+00 : f32
    %208 = vector.broadcast %cst_45 : f32 to vector<2x32xf32>
    %209 = arith.addf %208, %207 : vector<2x32xf32>
    %210 = arith.divf %208, %209 : vector<2x32xf32>
    %211 = vector.extract_strided_slice %176 {offsets = [0, 192], sizes = [2, 32], strides = [1, 1]} : vector<2x256xf32> to vector<2x32xf32>
    %212 = vector.extract_strided_slice %176 {offsets = [0, 224], sizes = [2, 32], strides = [1, 1]} : vector<2x256xf32> to vector<2x32xf32>
    %213 = arith.mulf %204, %212 : vector<2x32xf32>
    %214 = arith.addf %211, %213 : vector<2x32xf32>
    %215 = math.tanh %214 : vector<2x32xf32>
    %cst_46 = arith.constant 1.000000e+00 : f32
    %216 = vector.broadcast %cst_46 : f32 to vector<2x32xf32>
    %217 = arith.subf %216, %210 : vector<2x32xf32>
    %218 = arith.mulf %217, %215 : vector<2x32xf32>
    %219 = arith.mulf %210, %164 : vector<2x32xf32>
    %220 = arith.addf %218, %219 : vector<2x32xf32>
    %c2_i32 = arith.constant 2 : i32
    %221 = vector.broadcast %c2_i32 : i32 to vector<2x1xi32>
    %222 = arith.cmpi sgt, %8, %221 : vector<2x1xi32>
    %223 = arith.extui %222 : vector<2x1xi1> to vector<2x1xi32>
    %224 = arith.sitofp %223 : vector<2x1xi32> to vector<2x1xf32>
    %c5_i32 = arith.constant 5 : i32
    %225 = vector.broadcast %c5_i32 : i32 to vector<2x1xi32>
    %226 = arith.cmpi sgt, %8, %225 : vector<2x1xi32>
    %227 = arith.extui %226 : vector<2x1xi1> to vector<2x1xi32>
    %228 = arith.sitofp %227 : vector<2x1xi32> to vector<2x1xf32>
    %229 = vector.broadcast %224 : vector<2x1xf32> to vector<2x32xf32>
    %230 = arith.mulf %229, %198 : vector<2x32xf32>
    %cst_47 = arith.constant 1.000000e+00 : f32
    %231 = vector.broadcast %cst_47 : f32 to vector<2x1xf32>
    %232 = arith.subf %231, %224 : vector<2x1xf32>
    %233 = vector.broadcast %232 : vector<2x1xf32> to vector<2x32xf32>
    %234 = arith.mulf %233, %157 : vector<2x32xf32>
    %235 = arith.addf %230, %234 : vector<2x32xf32>
    %236 = vector.broadcast %228 : vector<2x1xf32> to vector<2x32xf32>
    %237 = arith.mulf %236, %220 : vector<2x32xf32>
    %cst_48 = arith.constant 1.000000e+00 : f32
    %238 = vector.broadcast %cst_48 : f32 to vector<2x1xf32>
    %239 = arith.subf %238, %228 : vector<2x1xf32>
    %240 = vector.broadcast %239 : vector<2x1xf32> to vector<2x32xf32>
    %241 = arith.mulf %240, %164 : vector<2x32xf32>
    %242 = arith.addf %237, %241 : vector<2x32xf32>
    %243 = vector.broadcast %224 : vector<2x1xf32> to vector<2x32xf32>
    %244 = arith.mulf %243, %198 : vector<2x32xf32>
    %245 = vector.broadcast %228 : vector<2x1xf32> to vector<2x32xf32>
    %246 = arith.mulf %245, %220 : vector<2x32xf32>
    %247 = vector.extract_strided_slice %7 {offsets = [6, 0], sizes = [2, 32], strides = [1, 1]} : vector<16x32xf32> to vector<2x32xf32>
    %248 = vector.extract_strided_slice %7 {offsets = [8, 0], sizes = [2, 32], strides = [1, 1]} : vector<16x32xf32> to vector<2x32xf32>
    %249 = tpu.concatenate %247, %235, %248, %242 in 1 : vector<2x32xf32>, vector<2x32xf32>, vector<2x32xf32>, vector<2x32xf32> -> vector<2x128xf32>
    %c0_49 = arith.constant 0 : index
    %c0_50 = arith.constant 0 : index
    %250 = vector.load %arg4[%c0_49, %c0_50] : memref<128x256xf32, #tpu.memory_space<vmem>>, vector<128x256xf32>
    %cst_51 = arith.constant dense<0.000000e+00> : vector<2x256xf32>
    %251 = tpu.matmul %249, %250, %cst_51 {dimension_numbers = #tpu.dot_dimension_numbers<[1], [0], [0], [1], [0, 0, 1, 1], [], []>} : vector<2x128xf32>, vector<128x256xf32>, vector<2x256xf32> -> vector<2x256xf32>
    %c0_52 = arith.constant 0 : index
    %c0_53 = arith.constant 0 : index
    %252 = vector.load %arg5[%c0_52, %c0_53] : memref<1x256xf32, #tpu.memory_space<vmem>>, vector<1x256xf32>
    %253 = vector.broadcast %252 : vector<1x256xf32> to vector<2x256xf32>
    %254 = arith.addf %251, %253 : vector<2x256xf32>
    %255 = vector.extract_strided_slice %254 {offsets = [0, 0], sizes = [2, 32], strides = [1, 1]} : vector<2x256xf32> to vector<2x32xf32>
    %256 = arith.negf %255 : vector<2x32xf32>
    %257 = math.exp %256 : vector<2x32xf32>
    %cst_54 = arith.constant 1.000000e+00 : f32
    %258 = vector.broadcast %cst_54 : f32 to vector<2x32xf32>
    %259 = arith.addf %258, %257 : vector<2x32xf32>
    %260 = arith.divf %258, %259 : vector<2x32xf32>
    %261 = vector.extract_strided_slice %254 {offsets = [0, 32], sizes = [2, 32], strides = [1, 1]} : vector<2x256xf32> to vector<2x32xf32>
    %262 = arith.negf %261 : vector<2x32xf32>
    %263 = math.exp %262 : vector<2x32xf32>
    %cst_55 = arith.constant 1.000000e+00 : f32
    %264 = vector.broadcast %cst_55 : f32 to vector<2x32xf32>
    %265 = arith.addf %264, %263 : vector<2x32xf32>
    %266 = arith.divf %264, %265 : vector<2x32xf32>
    %267 = vector.extract_strided_slice %254 {offsets = [0, 64], sizes = [2, 32], strides = [1, 1]} : vector<2x256xf32> to vector<2x32xf32>
    %268 = vector.extract_strided_slice %254 {offsets = [0, 96], sizes = [2, 32], strides = [1, 1]} : vector<2x256xf32> to vector<2x32xf32>
    %269 = arith.mulf %260, %268 : vector<2x32xf32>
    %270 = arith.addf %267, %269 : vector<2x32xf32>
    %271 = math.tanh %270 : vector<2x32xf32>
    %cst_56 = arith.constant 1.000000e+00 : f32
    %272 = vector.broadcast %cst_56 : f32 to vector<2x32xf32>
    %273 = arith.subf %272, %266 : vector<2x32xf32>
    %274 = arith.mulf %273, %271 : vector<2x32xf32>
    %275 = arith.mulf %266, %235 : vector<2x32xf32>
    %276 = arith.addf %274, %275 : vector<2x32xf32>
    %277 = vector.extract_strided_slice %254 {offsets = [0, 128], sizes = [2, 32], strides = [1, 1]} : vector<2x256xf32> to vector<2x32xf32>
    %278 = arith.negf %277 : vector<2x32xf32>
    %279 = math.exp %278 : vector<2x32xf32>
    %cst_57 = arith.constant 1.000000e+00 : f32
    %280 = vector.broadcast %cst_57 : f32 to vector<2x32xf32>
    %281 = arith.addf %280, %279 : vector<2x32xf32>
    %282 = arith.divf %280, %281 : vector<2x32xf32>
    %283 = vector.extract_strided_slice %254 {offsets = [0, 160], sizes = [2, 32], strides = [1, 1]} : vector<2x256xf32> to vector<2x32xf32>
    %284 = arith.negf %283 : vector<2x32xf32>
    %285 = math.exp %284 : vector<2x32xf32>
    %cst_58 = arith.constant 1.000000e+00 : f32
    %286 = vector.broadcast %cst_58 : f32 to vector<2x32xf32>
    %287 = arith.addf %286, %285 : vector<2x32xf32>
    %288 = arith.divf %286, %287 : vector<2x32xf32>
    %289 = vector.extract_strided_slice %254 {offsets = [0, 192], sizes = [2, 32], strides = [1, 1]} : vector<2x256xf32> to vector<2x32xf32>
    %290 = vector.extract_strided_slice %254 {offsets = [0, 224], sizes = [2, 32], strides = [1, 1]} : vector<2x256xf32> to vector<2x32xf32>
    %291 = arith.mulf %282, %290 : vector<2x32xf32>
    %292 = arith.addf %289, %291 : vector<2x32xf32>
    %293 = math.tanh %292 : vector<2x32xf32>
    %cst_59 = arith.constant 1.000000e+00 : f32
    %294 = vector.broadcast %cst_59 : f32 to vector<2x32xf32>
    %295 = arith.subf %294, %288 : vector<2x32xf32>
    %296 = arith.mulf %295, %293 : vector<2x32xf32>
    %297 = arith.mulf %288, %242 : vector<2x32xf32>
    %298 = arith.addf %296, %297 : vector<2x32xf32>
    %c3_i32 = arith.constant 3 : i32
    %299 = vector.broadcast %c3_i32 : i32 to vector<2x1xi32>
    %300 = arith.cmpi sgt, %8, %299 : vector<2x1xi32>
    %301 = arith.extui %300 : vector<2x1xi1> to vector<2x1xi32>
    %302 = arith.sitofp %301 : vector<2x1xi32> to vector<2x1xf32>
    %c4_i32 = arith.constant 4 : i32
    %303 = vector.broadcast %c4_i32 : i32 to vector<2x1xi32>
    %304 = arith.cmpi sgt, %8, %303 : vector<2x1xi32>
    %305 = arith.extui %304 : vector<2x1xi1> to vector<2x1xi32>
    %306 = arith.sitofp %305 : vector<2x1xi32> to vector<2x1xf32>
    %307 = vector.broadcast %302 : vector<2x1xf32> to vector<2x32xf32>
    %308 = arith.mulf %307, %276 : vector<2x32xf32>
    %cst_60 = arith.constant 1.000000e+00 : f32
    %309 = vector.broadcast %cst_60 : f32 to vector<2x1xf32>
    %310 = arith.subf %309, %302 : vector<2x1xf32>
    %311 = vector.broadcast %310 : vector<2x1xf32> to vector<2x32xf32>
    %312 = arith.mulf %311, %235 : vector<2x32xf32>
    %313 = arith.addf %308, %312 : vector<2x32xf32>
    %314 = vector.broadcast %306 : vector<2x1xf32> to vector<2x32xf32>
    %315 = arith.mulf %314, %298 : vector<2x32xf32>
    %cst_61 = arith.constant 1.000000e+00 : f32
    %316 = vector.broadcast %cst_61 : f32 to vector<2x1xf32>
    %317 = arith.subf %316, %306 : vector<2x1xf32>
    %318 = vector.broadcast %317 : vector<2x1xf32> to vector<2x32xf32>
    %319 = arith.mulf %318, %242 : vector<2x32xf32>
    %320 = arith.addf %315, %319 : vector<2x32xf32>
    %321 = vector.broadcast %302 : vector<2x1xf32> to vector<2x32xf32>
    %322 = arith.mulf %321, %276 : vector<2x32xf32>
    %323 = vector.broadcast %306 : vector<2x1xf32> to vector<2x32xf32>
    %324 = arith.mulf %323, %298 : vector<2x32xf32>
    %325 = vector.extract_strided_slice %7 {offsets = [8, 0], sizes = [2, 32], strides = [1, 1]} : vector<16x32xf32> to vector<2x32xf32>
    %326 = vector.extract_strided_slice %7 {offsets = [6, 0], sizes = [2, 32], strides = [1, 1]} : vector<16x32xf32> to vector<2x32xf32>
    %327 = tpu.concatenate %325, %313, %326, %320 in 1 : vector<2x32xf32>, vector<2x32xf32>, vector<2x32xf32>, vector<2x32xf32> -> vector<2x128xf32>
    %c0_62 = arith.constant 0 : index
    %c0_63 = arith.constant 0 : index
    %328 = vector.load %arg4[%c0_62, %c0_63] : memref<128x256xf32, #tpu.memory_space<vmem>>, vector<128x256xf32>
    %cst_64 = arith.constant dense<0.000000e+00> : vector<2x256xf32>
    %329 = tpu.matmul %327, %328, %cst_64 {dimension_numbers = #tpu.dot_dimension_numbers<[1], [0], [0], [1], [0, 0, 1, 1], [], []>} : vector<2x128xf32>, vector<128x256xf32>, vector<2x256xf32> -> vector<2x256xf32>
    %c0_65 = arith.constant 0 : index
    %c0_66 = arith.constant 0 : index
    %330 = vector.load %arg5[%c0_65, %c0_66] : memref<1x256xf32, #tpu.memory_space<vmem>>, vector<1x256xf32>
    %331 = vector.broadcast %330 : vector<1x256xf32> to vector<2x256xf32>
    %332 = arith.addf %329, %331 : vector<2x256xf32>
    %333 = vector.extract_strided_slice %332 {offsets = [0, 0], sizes = [2, 32], strides = [1, 1]} : vector<2x256xf32> to vector<2x32xf32>
    %334 = arith.negf %333 : vector<2x32xf32>
    %335 = math.exp %334 : vector<2x32xf32>
    %cst_67 = arith.constant 1.000000e+00 : f32
    %336 = vector.broadcast %cst_67 : f32 to vector<2x32xf32>
    %337 = arith.addf %336, %335 : vector<2x32xf32>
    %338 = arith.divf %336, %337 : vector<2x32xf32>
    %339 = vector.extract_strided_slice %332 {offsets = [0, 32], sizes = [2, 32], strides = [1, 1]} : vector<2x256xf32> to vector<2x32xf32>
    %340 = arith.negf %339 : vector<2x32xf32>
    %341 = math.exp %340 : vector<2x32xf32>
    %cst_68 = arith.constant 1.000000e+00 : f32
    %342 = vector.broadcast %cst_68 : f32 to vector<2x32xf32>
    %343 = arith.addf %342, %341 : vector<2x32xf32>
    %344 = arith.divf %342, %343 : vector<2x32xf32>
    %345 = vector.extract_strided_slice %332 {offsets = [0, 64], sizes = [2, 32], strides = [1, 1]} : vector<2x256xf32> to vector<2x32xf32>
    %346 = vector.extract_strided_slice %332 {offsets = [0, 96], sizes = [2, 32], strides = [1, 1]} : vector<2x256xf32> to vector<2x32xf32>
    %347 = arith.mulf %338, %346 : vector<2x32xf32>
    %348 = arith.addf %345, %347 : vector<2x32xf32>
    %349 = math.tanh %348 : vector<2x32xf32>
    %cst_69 = arith.constant 1.000000e+00 : f32
    %350 = vector.broadcast %cst_69 : f32 to vector<2x32xf32>
    %351 = arith.subf %350, %344 : vector<2x32xf32>
    %352 = arith.mulf %351, %349 : vector<2x32xf32>
    %353 = arith.mulf %344, %313 : vector<2x32xf32>
    %354 = arith.addf %352, %353 : vector<2x32xf32>
    %355 = vector.extract_strided_slice %332 {offsets = [0, 128], sizes = [2, 32], strides = [1, 1]} : vector<2x256xf32> to vector<2x32xf32>
    %356 = arith.negf %355 : vector<2x32xf32>
    %357 = math.exp %356 : vector<2x32xf32>
    %cst_70 = arith.constant 1.000000e+00 : f32
    %358 = vector.broadcast %cst_70 : f32 to vector<2x32xf32>
    %359 = arith.addf %358, %357 : vector<2x32xf32>
    %360 = arith.divf %358, %359 : vector<2x32xf32>
    %361 = vector.extract_strided_slice %332 {offsets = [0, 160], sizes = [2, 32], strides = [1, 1]} : vector<2x256xf32> to vector<2x32xf32>
    %362 = arith.negf %361 : vector<2x32xf32>
    %363 = math.exp %362 : vector<2x32xf32>
    %cst_71 = arith.constant 1.000000e+00 : f32
    %364 = vector.broadcast %cst_71 : f32 to vector<2x32xf32>
    %365 = arith.addf %364, %363 : vector<2x32xf32>
    %366 = arith.divf %364, %365 : vector<2x32xf32>
    %367 = vector.extract_strided_slice %332 {offsets = [0, 192], sizes = [2, 32], strides = [1, 1]} : vector<2x256xf32> to vector<2x32xf32>
    %368 = vector.extract_strided_slice %332 {offsets = [0, 224], sizes = [2, 32], strides = [1, 1]} : vector<2x256xf32> to vector<2x32xf32>
    %369 = arith.mulf %360, %368 : vector<2x32xf32>
    %370 = arith.addf %367, %369 : vector<2x32xf32>
    %371 = math.tanh %370 : vector<2x32xf32>
    %cst_72 = arith.constant 1.000000e+00 : f32
    %372 = vector.broadcast %cst_72 : f32 to vector<2x32xf32>
    %373 = arith.subf %372, %366 : vector<2x32xf32>
    %374 = arith.mulf %373, %371 : vector<2x32xf32>
    %375 = arith.mulf %366, %320 : vector<2x32xf32>
    %376 = arith.addf %374, %375 : vector<2x32xf32>
    %c4_i32_73 = arith.constant 4 : i32
    %377 = vector.broadcast %c4_i32_73 : i32 to vector<2x1xi32>
    %378 = arith.cmpi sgt, %8, %377 : vector<2x1xi32>
    %379 = arith.extui %378 : vector<2x1xi1> to vector<2x1xi32>
    %380 = arith.sitofp %379 : vector<2x1xi32> to vector<2x1xf32>
    %c3_i32_74 = arith.constant 3 : i32
    %381 = vector.broadcast %c3_i32_74 : i32 to vector<2x1xi32>
    %382 = arith.cmpi sgt, %8, %381 : vector<2x1xi32>
    %383 = arith.extui %382 : vector<2x1xi1> to vector<2x1xi32>
    %384 = arith.sitofp %383 : vector<2x1xi32> to vector<2x1xf32>
    %385 = vector.broadcast %380 : vector<2x1xf32> to vector<2x32xf32>
    %386 = arith.mulf %385, %354 : vector<2x32xf32>
    %cst_75 = arith.constant 1.000000e+00 : f32
    %387 = vector.broadcast %cst_75 : f32 to vector<2x1xf32>
    %388 = arith.subf %387, %380 : vector<2x1xf32>
    %389 = vector.broadcast %388 : vector<2x1xf32> to vector<2x32xf32>
    %390 = arith.mulf %389, %313 : vector<2x32xf32>
    %391 = arith.addf %386, %390 : vector<2x32xf32>
    %392 = vector.broadcast %384 : vector<2x1xf32> to vector<2x32xf32>
    %393 = arith.mulf %392, %376 : vector<2x32xf32>
    %cst_76 = arith.constant 1.000000e+00 : f32
    %394 = vector.broadcast %cst_76 : f32 to vector<2x1xf32>
    %395 = arith.subf %394, %384 : vector<2x1xf32>
    %396 = vector.broadcast %395 : vector<2x1xf32> to vector<2x32xf32>
    %397 = arith.mulf %396, %320 : vector<2x32xf32>
    %398 = arith.addf %393, %397 : vector<2x32xf32>
    %399 = vector.broadcast %380 : vector<2x1xf32> to vector<2x32xf32>
    %400 = arith.mulf %399, %354 : vector<2x32xf32>
    %401 = vector.broadcast %384 : vector<2x1xf32> to vector<2x32xf32>
    %402 = arith.mulf %401, %376 : vector<2x32xf32>
    %403 = vector.extract_strided_slice %7 {offsets = [10, 0], sizes = [2, 32], strides = [1, 1]} : vector<16x32xf32> to vector<2x32xf32>
    %404 = vector.extract_strided_slice %7 {offsets = [4, 0], sizes = [2, 32], strides = [1, 1]} : vector<16x32xf32> to vector<2x32xf32>
    %405 = tpu.concatenate %403, %391, %404, %398 in 1 : vector<2x32xf32>, vector<2x32xf32>, vector<2x32xf32>, vector<2x32xf32> -> vector<2x128xf32>
    %c0_77 = arith.constant 0 : index
    %c0_78 = arith.constant 0 : index
    %406 = vector.load %arg4[%c0_77, %c0_78] : memref<128x256xf32, #tpu.memory_space<vmem>>, vector<128x256xf32>
    %cst_79 = arith.constant dense<0.000000e+00> : vector<2x256xf32>
    %407 = tpu.matmul %405, %406, %cst_79 {dimension_numbers = #tpu.dot_dimension_numbers<[1], [0], [0], [1], [0, 0, 1, 1], [], []>} : vector<2x128xf32>, vector<128x256xf32>, vector<2x256xf32> -> vector<2x256xf32>
    %c0_80 = arith.constant 0 : index
    %c0_81 = arith.constant 0 : index
    %408 = vector.load %arg5[%c0_80, %c0_81] : memref<1x256xf32, #tpu.memory_space<vmem>>, vector<1x256xf32>
    %409 = vector.broadcast %408 : vector<1x256xf32> to vector<2x256xf32>
    %410 = arith.addf %407, %409 : vector<2x256xf32>
    %411 = vector.extract_strided_slice %410 {offsets = [0, 0], sizes = [2, 32], strides = [1, 1]} : vector<2x256xf32> to vector<2x32xf32>
    %412 = arith.negf %411 : vector<2x32xf32>
    %413 = math.exp %412 : vector<2x32xf32>
    %cst_82 = arith.constant 1.000000e+00 : f32
    %414 = vector.broadcast %cst_82 : f32 to vector<2x32xf32>
    %415 = arith.addf %414, %413 : vector<2x32xf32>
    %416 = arith.divf %414, %415 : vector<2x32xf32>
    %417 = vector.extract_strided_slice %410 {offsets = [0, 32], sizes = [2, 32], strides = [1, 1]} : vector<2x256xf32> to vector<2x32xf32>
    %418 = arith.negf %417 : vector<2x32xf32>
    %419 = math.exp %418 : vector<2x32xf32>
    %cst_83 = arith.constant 1.000000e+00 : f32
    %420 = vector.broadcast %cst_83 : f32 to vector<2x32xf32>
    %421 = arith.addf %420, %419 : vector<2x32xf32>
    %422 = arith.divf %420, %421 : vector<2x32xf32>
    %423 = vector.extract_strided_slice %410 {offsets = [0, 64], sizes = [2, 32], strides = [1, 1]} : vector<2x256xf32> to vector<2x32xf32>
    %424 = vector.extract_strided_slice %410 {offsets = [0, 96], sizes = [2, 32], strides = [1, 1]} : vector<2x256xf32> to vector<2x32xf32>
    %425 = arith.mulf %416, %424 : vector<2x32xf32>
    %426 = arith.addf %423, %425 : vector<2x32xf32>
    %427 = math.tanh %426 : vector<2x32xf32>
    %cst_84 = arith.constant 1.000000e+00 : f32
    %428 = vector.broadcast %cst_84 : f32 to vector<2x32xf32>
    %429 = arith.subf %428, %422 : vector<2x32xf32>
    %430 = arith.mulf %429, %427 : vector<2x32xf32>
    %431 = arith.mulf %422, %391 : vector<2x32xf32>
    %432 = arith.addf %430, %431 : vector<2x32xf32>
    %433 = vector.extract_strided_slice %410 {offsets = [0, 128], sizes = [2, 32], strides = [1, 1]} : vector<2x256xf32> to vector<2x32xf32>
    %434 = arith.negf %433 : vector<2x32xf32>
    %435 = math.exp %434 : vector<2x32xf32>
    %cst_85 = arith.constant 1.000000e+00 : f32
    %436 = vector.broadcast %cst_85 : f32 to vector<2x32xf32>
    %437 = arith.addf %436, %435 : vector<2x32xf32>
    %438 = arith.divf %436, %437 : vector<2x32xf32>
    %439 = vector.extract_strided_slice %410 {offsets = [0, 160], sizes = [2, 32], strides = [1, 1]} : vector<2x256xf32> to vector<2x32xf32>
    %440 = arith.negf %439 : vector<2x32xf32>
    %441 = math.exp %440 : vector<2x32xf32>
    %cst_86 = arith.constant 1.000000e+00 : f32
    %442 = vector.broadcast %cst_86 : f32 to vector<2x32xf32>
    %443 = arith.addf %442, %441 : vector<2x32xf32>
    %444 = arith.divf %442, %443 : vector<2x32xf32>
    %445 = vector.extract_strided_slice %410 {offsets = [0, 192], sizes = [2, 32], strides = [1, 1]} : vector<2x256xf32> to vector<2x32xf32>
    %446 = vector.extract_strided_slice %410 {offsets = [0, 224], sizes = [2, 32], strides = [1, 1]} : vector<2x256xf32> to vector<2x32xf32>
    %447 = arith.mulf %438, %446 : vector<2x32xf32>
    %448 = arith.addf %445, %447 : vector<2x32xf32>
    %449 = math.tanh %448 : vector<2x32xf32>
    %cst_87 = arith.constant 1.000000e+00 : f32
    %450 = vector.broadcast %cst_87 : f32 to vector<2x32xf32>
    %451 = arith.subf %450, %444 : vector<2x32xf32>
    %452 = arith.mulf %451, %449 : vector<2x32xf32>
    %453 = arith.mulf %444, %398 : vector<2x32xf32>
    %454 = arith.addf %452, %453 : vector<2x32xf32>
    %c5_i32_88 = arith.constant 5 : i32
    %455 = vector.broadcast %c5_i32_88 : i32 to vector<2x1xi32>
    %456 = arith.cmpi sgt, %8, %455 : vector<2x1xi32>
    %457 = arith.extui %456 : vector<2x1xi1> to vector<2x1xi32>
    %458 = arith.sitofp %457 : vector<2x1xi32> to vector<2x1xf32>
    %c2_i32_89 = arith.constant 2 : i32
    %459 = vector.broadcast %c2_i32_89 : i32 to vector<2x1xi32>
    %460 = arith.cmpi sgt, %8, %459 : vector<2x1xi32>
    %461 = arith.extui %460 : vector<2x1xi1> to vector<2x1xi32>
    %462 = arith.sitofp %461 : vector<2x1xi32> to vector<2x1xf32>
    %463 = vector.broadcast %458 : vector<2x1xf32> to vector<2x32xf32>
    %464 = arith.mulf %463, %432 : vector<2x32xf32>
    %cst_90 = arith.constant 1.000000e+00 : f32
    %465 = vector.broadcast %cst_90 : f32 to vector<2x1xf32>
    %466 = arith.subf %465, %458 : vector<2x1xf32>
    %467 = vector.broadcast %466 : vector<2x1xf32> to vector<2x32xf32>
    %468 = arith.mulf %467, %391 : vector<2x32xf32>
    %469 = arith.addf %464, %468 : vector<2x32xf32>
    %470 = vector.broadcast %462 : vector<2x1xf32> to vector<2x32xf32>
    %471 = arith.mulf %470, %454 : vector<2x32xf32>
    %cst_91 = arith.constant 1.000000e+00 : f32
    %472 = vector.broadcast %cst_91 : f32 to vector<2x1xf32>
    %473 = arith.subf %472, %462 : vector<2x1xf32>
    %474 = vector.broadcast %473 : vector<2x1xf32> to vector<2x32xf32>
    %475 = arith.mulf %474, %398 : vector<2x32xf32>
    %476 = arith.addf %471, %475 : vector<2x32xf32>
    %477 = vector.broadcast %458 : vector<2x1xf32> to vector<2x32xf32>
    %478 = arith.mulf %477, %432 : vector<2x32xf32>
    %479 = vector.broadcast %462 : vector<2x1xf32> to vector<2x32xf32>
    %480 = arith.mulf %479, %454 : vector<2x32xf32>
    %481 = vector.extract_strided_slice %7 {offsets = [12, 0], sizes = [2, 32], strides = [1, 1]} : vector<16x32xf32> to vector<2x32xf32>
    %482 = vector.extract_strided_slice %7 {offsets = [2, 0], sizes = [2, 32], strides = [1, 1]} : vector<16x32xf32> to vector<2x32xf32>
    %483 = tpu.concatenate %481, %469, %482, %476 in 1 : vector<2x32xf32>, vector<2x32xf32>, vector<2x32xf32>, vector<2x32xf32> -> vector<2x128xf32>
    %c0_92 = arith.constant 0 : index
    %c0_93 = arith.constant 0 : index
    %484 = vector.load %arg4[%c0_92, %c0_93] : memref<128x256xf32, #tpu.memory_space<vmem>>, vector<128x256xf32>
    %cst_94 = arith.constant dense<0.000000e+00> : vector<2x256xf32>
    %485 = tpu.matmul %483, %484, %cst_94 {dimension_numbers = #tpu.dot_dimension_numbers<[1], [0], [0], [1], [0, 0, 1, 1], [], []>} : vector<2x128xf32>, vector<128x256xf32>, vector<2x256xf32> -> vector<2x256xf32>
    %c0_95 = arith.constant 0 : index
    %c0_96 = arith.constant 0 : index
    %486 = vector.load %arg5[%c0_95, %c0_96] : memref<1x256xf32, #tpu.memory_space<vmem>>, vector<1x256xf32>
    %487 = vector.broadcast %486 : vector<1x256xf32> to vector<2x256xf32>
    %488 = arith.addf %485, %487 : vector<2x256xf32>
    %489 = vector.extract_strided_slice %488 {offsets = [0, 0], sizes = [2, 32], strides = [1, 1]} : vector<2x256xf32> to vector<2x32xf32>
    %490 = arith.negf %489 : vector<2x32xf32>
    %491 = math.exp %490 : vector<2x32xf32>
    %cst_97 = arith.constant 1.000000e+00 : f32
    %492 = vector.broadcast %cst_97 : f32 to vector<2x32xf32>
    %493 = arith.addf %492, %491 : vector<2x32xf32>
    %494 = arith.divf %492, %493 : vector<2x32xf32>
    %495 = vector.extract_strided_slice %488 {offsets = [0, 32], sizes = [2, 32], strides = [1, 1]} : vector<2x256xf32> to vector<2x32xf32>
    %496 = arith.negf %495 : vector<2x32xf32>
    %497 = math.exp %496 : vector<2x32xf32>
    %cst_98 = arith.constant 1.000000e+00 : f32
    %498 = vector.broadcast %cst_98 : f32 to vector<2x32xf32>
    %499 = arith.addf %498, %497 : vector<2x32xf32>
    %500 = arith.divf %498, %499 : vector<2x32xf32>
    %501 = vector.extract_strided_slice %488 {offsets = [0, 64], sizes = [2, 32], strides = [1, 1]} : vector<2x256xf32> to vector<2x32xf32>
    %502 = vector.extract_strided_slice %488 {offsets = [0, 96], sizes = [2, 32], strides = [1, 1]} : vector<2x256xf32> to vector<2x32xf32>
    %503 = arith.mulf %494, %502 : vector<2x32xf32>
    %504 = arith.addf %501, %503 : vector<2x32xf32>
    %505 = math.tanh %504 : vector<2x32xf32>
    %cst_99 = arith.constant 1.000000e+00 : f32
    %506 = vector.broadcast %cst_99 : f32 to vector<2x32xf32>
    %507 = arith.subf %506, %500 : vector<2x32xf32>
    %508 = arith.mulf %507, %505 : vector<2x32xf32>
    %509 = arith.mulf %500, %469 : vector<2x32xf32>
    %510 = arith.addf %508, %509 : vector<2x32xf32>
    %511 = vector.extract_strided_slice %488 {offsets = [0, 128], sizes = [2, 32], strides = [1, 1]} : vector<2x256xf32> to vector<2x32xf32>
    %512 = arith.negf %511 : vector<2x32xf32>
    %513 = math.exp %512 : vector<2x32xf32>
    %cst_100 = arith.constant 1.000000e+00 : f32
    %514 = vector.broadcast %cst_100 : f32 to vector<2x32xf32>
    %515 = arith.addf %514, %513 : vector<2x32xf32>
    %516 = arith.divf %514, %515 : vector<2x32xf32>
    %517 = vector.extract_strided_slice %488 {offsets = [0, 160], sizes = [2, 32], strides = [1, 1]} : vector<2x256xf32> to vector<2x32xf32>
    %518 = arith.negf %517 : vector<2x32xf32>
    %519 = math.exp %518 : vector<2x32xf32>
    %cst_101 = arith.constant 1.000000e+00 : f32
    %520 = vector.broadcast %cst_101 : f32 to vector<2x32xf32>
    %521 = arith.addf %520, %519 : vector<2x32xf32>
    %522 = arith.divf %520, %521 : vector<2x32xf32>
    %523 = vector.extract_strided_slice %488 {offsets = [0, 192], sizes = [2, 32], strides = [1, 1]} : vector<2x256xf32> to vector<2x32xf32>
    %524 = vector.extract_strided_slice %488 {offsets = [0, 224], sizes = [2, 32], strides = [1, 1]} : vector<2x256xf32> to vector<2x32xf32>
    %525 = arith.mulf %516, %524 : vector<2x32xf32>
    %526 = arith.addf %523, %525 : vector<2x32xf32>
    %527 = math.tanh %526 : vector<2x32xf32>
    %cst_102 = arith.constant 1.000000e+00 : f32
    %528 = vector.broadcast %cst_102 : f32 to vector<2x32xf32>
    %529 = arith.subf %528, %522 : vector<2x32xf32>
    %530 = arith.mulf %529, %527 : vector<2x32xf32>
    %531 = arith.mulf %522, %476 : vector<2x32xf32>
    %532 = arith.addf %530, %531 : vector<2x32xf32>
    %c6_i32_103 = arith.constant 6 : i32
    %533 = vector.broadcast %c6_i32_103 : i32 to vector<2x1xi32>
    %534 = arith.cmpi sgt, %8, %533 : vector<2x1xi32>
    %535 = arith.extui %534 : vector<2x1xi1> to vector<2x1xi32>
    %536 = arith.sitofp %535 : vector<2x1xi32> to vector<2x1xf32>
    %c1_i32_104 = arith.constant 1 : i32
    %537 = vector.broadcast %c1_i32_104 : i32 to vector<2x1xi32>
    %538 = arith.cmpi sgt, %8, %537 : vector<2x1xi32>
    %539 = arith.extui %538 : vector<2x1xi1> to vector<2x1xi32>
    %540 = arith.sitofp %539 : vector<2x1xi32> to vector<2x1xf32>
    %541 = vector.broadcast %536 : vector<2x1xf32> to vector<2x32xf32>
    %542 = arith.mulf %541, %510 : vector<2x32xf32>
    %cst_105 = arith.constant 1.000000e+00 : f32
    %543 = vector.broadcast %cst_105 : f32 to vector<2x1xf32>
    %544 = arith.subf %543, %536 : vector<2x1xf32>
    %545 = vector.broadcast %544 : vector<2x1xf32> to vector<2x32xf32>
    %546 = arith.mulf %545, %469 : vector<2x32xf32>
    %547 = arith.addf %542, %546 : vector<2x32xf32>
    %548 = vector.broadcast %540 : vector<2x1xf32> to vector<2x32xf32>
    %549 = arith.mulf %548, %532 : vector<2x32xf32>
    %cst_106 = arith.constant 1.000000e+00 : f32
    %550 = vector.broadcast %cst_106 : f32 to vector<2x1xf32>
    %551 = arith.subf %550, %540 : vector<2x1xf32>
    %552 = vector.broadcast %551 : vector<2x1xf32> to vector<2x32xf32>
    %553 = arith.mulf %552, %476 : vector<2x32xf32>
    %554 = arith.addf %549, %553 : vector<2x32xf32>
    %555 = vector.broadcast %536 : vector<2x1xf32> to vector<2x32xf32>
    %556 = arith.mulf %555, %510 : vector<2x32xf32>
    %557 = vector.broadcast %540 : vector<2x1xf32> to vector<2x32xf32>
    %558 = arith.mulf %557, %532 : vector<2x32xf32>
    %559 = vector.extract_strided_slice %7 {offsets = [14, 0], sizes = [2, 32], strides = [1, 1]} : vector<16x32xf32> to vector<2x32xf32>
    %560 = vector.extract_strided_slice %7 {offsets = [0, 0], sizes = [2, 32], strides = [1, 1]} : vector<16x32xf32> to vector<2x32xf32>
    %561 = tpu.concatenate %559, %547, %560, %554 in 1 : vector<2x32xf32>, vector<2x32xf32>, vector<2x32xf32>, vector<2x32xf32> -> vector<2x128xf32>
    %c0_107 = arith.constant 0 : index
    %c0_108 = arith.constant 0 : index
    %562 = vector.load %arg4[%c0_107, %c0_108] : memref<128x256xf32, #tpu.memory_space<vmem>>, vector<128x256xf32>
    %cst_109 = arith.constant dense<0.000000e+00> : vector<2x256xf32>
    %563 = tpu.matmul %561, %562, %cst_109 {dimension_numbers = #tpu.dot_dimension_numbers<[1], [0], [0], [1], [0, 0, 1, 1], [], []>} : vector<2x128xf32>, vector<128x256xf32>, vector<2x256xf32> -> vector<2x256xf32>
    %c0_110 = arith.constant 0 : index
    %c0_111 = arith.constant 0 : index
    %564 = vector.load %arg5[%c0_110, %c0_111] : memref<1x256xf32, #tpu.memory_space<vmem>>, vector<1x256xf32>
    %565 = vector.broadcast %564 : vector<1x256xf32> to vector<2x256xf32>
    %566 = arith.addf %563, %565 : vector<2x256xf32>
    %567 = vector.extract_strided_slice %566 {offsets = [0, 0], sizes = [2, 32], strides = [1, 1]} : vector<2x256xf32> to vector<2x32xf32>
    %568 = arith.negf %567 : vector<2x32xf32>
    %569 = math.exp %568 : vector<2x32xf32>
    %cst_112 = arith.constant 1.000000e+00 : f32
    %570 = vector.broadcast %cst_112 : f32 to vector<2x32xf32>
    %571 = arith.addf %570, %569 : vector<2x32xf32>
    %572 = arith.divf %570, %571 : vector<2x32xf32>
    %573 = vector.extract_strided_slice %566 {offsets = [0, 32], sizes = [2, 32], strides = [1, 1]} : vector<2x256xf32> to vector<2x32xf32>
    %574 = arith.negf %573 : vector<2x32xf32>
    %575 = math.exp %574 : vector<2x32xf32>
    %cst_113 = arith.constant 1.000000e+00 : f32
    %576 = vector.broadcast %cst_113 : f32 to vector<2x32xf32>
    %577 = arith.addf %576, %575 : vector<2x32xf32>
    %578 = arith.divf %576, %577 : vector<2x32xf32>
    %579 = vector.extract_strided_slice %566 {offsets = [0, 64], sizes = [2, 32], strides = [1, 1]} : vector<2x256xf32> to vector<2x32xf32>
    %580 = vector.extract_strided_slice %566 {offsets = [0, 96], sizes = [2, 32], strides = [1, 1]} : vector<2x256xf32> to vector<2x32xf32>
    %581 = arith.mulf %572, %580 : vector<2x32xf32>
    %582 = arith.addf %579, %581 : vector<2x32xf32>
    %583 = math.tanh %582 : vector<2x32xf32>
    %cst_114 = arith.constant 1.000000e+00 : f32
    %584 = vector.broadcast %cst_114 : f32 to vector<2x32xf32>
    %585 = arith.subf %584, %578 : vector<2x32xf32>
    %586 = arith.mulf %585, %583 : vector<2x32xf32>
    %587 = arith.mulf %578, %547 : vector<2x32xf32>
    %588 = arith.addf %586, %587 : vector<2x32xf32>
    %589 = vector.extract_strided_slice %566 {offsets = [0, 128], sizes = [2, 32], strides = [1, 1]} : vector<2x256xf32> to vector<2x32xf32>
    %590 = arith.negf %589 : vector<2x32xf32>
    %591 = math.exp %590 : vector<2x32xf32>
    %cst_115 = arith.constant 1.000000e+00 : f32
    %592 = vector.broadcast %cst_115 : f32 to vector<2x32xf32>
    %593 = arith.addf %592, %591 : vector<2x32xf32>
    %594 = arith.divf %592, %593 : vector<2x32xf32>
    %595 = vector.extract_strided_slice %566 {offsets = [0, 160], sizes = [2, 32], strides = [1, 1]} : vector<2x256xf32> to vector<2x32xf32>
    %596 = arith.negf %595 : vector<2x32xf32>
    %597 = math.exp %596 : vector<2x32xf32>
    %cst_116 = arith.constant 1.000000e+00 : f32
    %598 = vector.broadcast %cst_116 : f32 to vector<2x32xf32>
    %599 = arith.addf %598, %597 : vector<2x32xf32>
    %600 = arith.divf %598, %599 : vector<2x32xf32>
    %601 = vector.extract_strided_slice %566 {offsets = [0, 192], sizes = [2, 32], strides = [1, 1]} : vector<2x256xf32> to vector<2x32xf32>
    %602 = vector.extract_strided_slice %566 {offsets = [0, 224], sizes = [2, 32], strides = [1, 1]} : vector<2x256xf32> to vector<2x32xf32>
    %603 = arith.mulf %594, %602 : vector<2x32xf32>
    %604 = arith.addf %601, %603 : vector<2x32xf32>
    %605 = math.tanh %604 : vector<2x32xf32>
    %cst_117 = arith.constant 1.000000e+00 : f32
    %606 = vector.broadcast %cst_117 : f32 to vector<2x32xf32>
    %607 = arith.subf %606, %600 : vector<2x32xf32>
    %608 = arith.mulf %607, %605 : vector<2x32xf32>
    %609 = arith.mulf %600, %554 : vector<2x32xf32>
    %610 = arith.addf %608, %609 : vector<2x32xf32>
    %c7_i32_118 = arith.constant 7 : i32
    %611 = vector.broadcast %c7_i32_118 : i32 to vector<2x1xi32>
    %612 = arith.cmpi sgt, %8, %611 : vector<2x1xi32>
    %613 = arith.extui %612 : vector<2x1xi1> to vector<2x1xi32>
    %614 = arith.sitofp %613 : vector<2x1xi32> to vector<2x1xf32>
    %c0_i32_119 = arith.constant 0 : i32
    %615 = vector.broadcast %c0_i32_119 : i32 to vector<2x1xi32>
    %616 = arith.cmpi sgt, %8, %615 : vector<2x1xi32>
    %617 = arith.extui %616 : vector<2x1xi1> to vector<2x1xi32>
    %618 = arith.sitofp %617 : vector<2x1xi32> to vector<2x1xf32>
    %619 = vector.broadcast %614 : vector<2x1xf32> to vector<2x32xf32>
    %620 = arith.mulf %619, %588 : vector<2x32xf32>
    %cst_120 = arith.constant 1.000000e+00 : f32
    %621 = vector.broadcast %cst_120 : f32 to vector<2x1xf32>
    %622 = arith.subf %621, %614 : vector<2x1xf32>
    %623 = vector.broadcast %622 : vector<2x1xf32> to vector<2x32xf32>
    %624 = arith.mulf %623, %547 : vector<2x32xf32>
    %625 = arith.addf %620, %624 : vector<2x32xf32>
    %626 = vector.broadcast %618 : vector<2x1xf32> to vector<2x32xf32>
    %627 = arith.mulf %626, %610 : vector<2x32xf32>
    %cst_121 = arith.constant 1.000000e+00 : f32
    %628 = vector.broadcast %cst_121 : f32 to vector<2x1xf32>
    %629 = arith.subf %628, %618 : vector<2x1xf32>
    %630 = vector.broadcast %629 : vector<2x1xf32> to vector<2x32xf32>
    %631 = arith.mulf %630, %554 : vector<2x32xf32>
    %632 = arith.addf %627, %631 : vector<2x32xf32>
    %633 = vector.broadcast %614 : vector<2x1xf32> to vector<2x32xf32>
    %634 = arith.mulf %633, %588 : vector<2x32xf32>
    %635 = vector.broadcast %618 : vector<2x1xf32> to vector<2x32xf32>
    %636 = arith.mulf %635, %610 : vector<2x32xf32>
    %637 = arith.addf %88, %636 : vector<2x32xf32>
    %c0_122 = arith.constant 0 : index
    %c0_123 = arith.constant 0 : index
    %c0_124 = arith.constant 0 : index
    %638 = vector.load %arg6[%c0_122, %c0_123, %c0_124] : memref<8x2x32xf32, #tpu.memory_space<vmem>>, vector<1x2x32xf32>
    %639 = vector.shape_cast %638 : vector<1x2x32xf32> to vector<2x32xf32>
    %640 = vector.shape_cast %637 : vector<2x32xf32> to vector<1x2x32xf32>
    tpu.vector_store %arg6[%c0_122, %c0_123, %c0_124], %640 {strides = array<i32>} : memref<8x2x32xf32, #tpu.memory_space<vmem>>, vector<1x2x32xf32>,
    %641 = arith.addf %166, %558 : vector<2x32xf32>
    %c1_125 = arith.constant 1 : index
    %c0_126 = arith.constant 0 : index
    %c0_127 = arith.constant 0 : index
    %642 = vector.load %arg6[%c1_125, %c0_126, %c0_127] : memref<8x2x32xf32, #tpu.memory_space<vmem>>, vector<1x2x32xf32>
    %643 = vector.shape_cast %642 : vector<1x2x32xf32> to vector<2x32xf32>
    %644 = vector.shape_cast %641 : vector<2x32xf32> to vector<1x2x32xf32>
    tpu.vector_store %arg6[%c1_125, %c0_126, %c0_127], %644 {strides = array<i32>} : memref<8x2x32xf32, #tpu.memory_space<vmem>>, vector<1x2x32xf32>,
    %645 = arith.addf %244, %480 : vector<2x32xf32>
    %c2 = arith.constant 2 : index
    %c0_128 = arith.constant 0 : index
    %c0_129 = arith.constant 0 : index
    %646 = vector.load %arg6[%c2, %c0_128, %c0_129] : memref<8x2x32xf32, #tpu.memory_space<vmem>>, vector<1x2x32xf32>
    %647 = vector.shape_cast %646 : vector<1x2x32xf32> to vector<2x32xf32>
    %648 = vector.shape_cast %645 : vector<2x32xf32> to vector<1x2x32xf32>
    tpu.vector_store %arg6[%c2, %c0_128, %c0_129], %648 {strides = array<i32>} : memref<8x2x32xf32, #tpu.memory_space<vmem>>, vector<1x2x32xf32>,
    %649 = arith.addf %322, %402 : vector<2x32xf32>
    %c3 = arith.constant 3 : index
    %c0_130 = arith.constant 0 : index
    %c0_131 = arith.constant 0 : index
    %650 = vector.load %arg6[%c3, %c0_130, %c0_131] : memref<8x2x32xf32, #tpu.memory_space<vmem>>, vector<1x2x32xf32>
    %651 = vector.shape_cast %650 : vector<1x2x32xf32> to vector<2x32xf32>
    %652 = vector.shape_cast %649 : vector<2x32xf32> to vector<1x2x32xf32>
    tpu.vector_store %arg6[%c3, %c0_130, %c0_131], %652 {strides = array<i32>} : memref<8x2x32xf32, #tpu.memory_space<vmem>>, vector<1x2x32xf32>,
    %653 = arith.addf %400, %324 : vector<2x32xf32>
    %c4 = arith.constant 4 : index
    %c0_132 = arith.constant 0 : index
    %c0_133 = arith.constant 0 : index
    %654 = vector.load %arg6[%c4, %c0_132, %c0_133] : memref<8x2x32xf32, #tpu.memory_space<vmem>>, vector<1x2x32xf32>
    %655 = vector.shape_cast %654 : vector<1x2x32xf32> to vector<2x32xf32>
    %656 = vector.shape_cast %653 : vector<2x32xf32> to vector<1x2x32xf32>
    tpu.vector_store %arg6[%c4, %c0_132, %c0_133], %656 {strides = array<i32>} : memref<8x2x32xf32, #tpu.memory_space<vmem>>, vector<1x2x32xf32>,
    %657 = arith.addf %478, %246 : vector<2x32xf32>
    %c5 = arith.constant 5 : index
    %c0_134 = arith.constant 0 : index
    %c0_135 = arith.constant 0 : index
    %658 = vector.load %arg6[%c5, %c0_134, %c0_135] : memref<8x2x32xf32, #tpu.memory_space<vmem>>, vector<1x2x32xf32>
    %659 = vector.shape_cast %658 : vector<1x2x32xf32> to vector<2x32xf32>
    %660 = vector.shape_cast %657 : vector<2x32xf32> to vector<1x2x32xf32>
    tpu.vector_store %arg6[%c5, %c0_134, %c0_135], %660 {strides = array<i32>} : memref<8x2x32xf32, #tpu.memory_space<vmem>>, vector<1x2x32xf32>,
    %661 = arith.addf %556, %168 : vector<2x32xf32>
    %c6 = arith.constant 6 : index
    %c0_136 = arith.constant 0 : index
    %c0_137 = arith.constant 0 : index
    %662 = vector.load %arg6[%c6, %c0_136, %c0_137] : memref<8x2x32xf32, #tpu.memory_space<vmem>>, vector<1x2x32xf32>
    %663 = vector.shape_cast %662 : vector<1x2x32xf32> to vector<2x32xf32>
    %664 = vector.shape_cast %661 : vector<2x32xf32> to vector<1x2x32xf32>
    tpu.vector_store %arg6[%c6, %c0_136, %c0_137], %664 {strides = array<i32>} : memref<8x2x32xf32, #tpu.memory_space<vmem>>, vector<1x2x32xf32>,
    %665 = arith.addf %634, %90 : vector<2x32xf32>
    %c7 = arith.constant 7 : index
    %c0_138 = arith.constant 0 : index
    %c0_139 = arith.constant 0 : index
    %666 = vector.load %arg6[%c7, %c0_138, %c0_139] : memref<8x2x32xf32, #tpu.memory_space<vmem>>, vector<1x2x32xf32>
    %667 = vector.shape_cast %666 : vector<1x2x32xf32> to vector<2x32xf32>
    %668 = vector.shape_cast %665 : vector<2x32xf32> to vector<1x2x32xf32>
    tpu.vector_store %arg6[%c7, %c0_138, %c0_139], %668 {strides = array<i32>} : memref<8x2x32xf32, #tpu.memory_space<vmem>>, vector<1x2x32xf32>,
    %c0_140 = arith.constant 0 : index
    %c0_141 = arith.constant 0 : index
    %c0_142 = arith.constant 0 : index
    %669 = vector.load %arg7[%c0_140, %c0_141, %c0_142] : memref<2x2x32xf32, #tpu.memory_space<vmem>>, vector<1x2x32xf32>
    %670 = vector.shape_cast %669 : vector<1x2x32xf32> to vector<2x32xf32>
    %671 = vector.shape_cast %625 : vector<2x32xf32> to vector<1x2x32xf32>
    tpu.vector_store %arg7[%c0_140, %c0_141, %c0_142], %671 {strides = array<i32>} : memref<2x2x32xf32, #tpu.memory_space<vmem>>, vector<1x2x32xf32>,
    %c1_143 = arith.constant 1 : index
    %c0_144 = arith.constant 0 : index
    %c0_145 = arith.constant 0 : index
    %672 = vector.load %arg7[%c1_143, %c0_144, %c0_145] : memref<2x2x32xf32, #tpu.memory_space<vmem>>, vector<1x2x32xf32>
    %673 = vector.shape_cast %672 : vector<1x2x32xf32> to vector<2x32xf32>
    %674 = vector.shape_cast %632 : vector<2x32xf32> to vector<1x2x32xf32>
    tpu.vector_store %arg7[%c1_143, %c0_144, %c0_145], %674 {strides = array<i32>} : memref<2x2x32xf32, #tpu.memory_space<vmem>>, vector<1x2x32xf32>,
    return
  }
}

</mosaic_0001>

<bundles_post_ra>
// kernel: tpu_custom_call.1
= control target key start
LH: loop header
LB: loop body
LE: loop exit
PB: predicated region body
PF: predicated region fallthrough
CT: control target
= control target key end

     0   :  { %13 = vsyncpa [#allocation3], 0  ;;  %s2761_s0 = inlined_call_operand.vmem [shape: s32[16,1], index: 0, kind: input, shape index: {}]   ;;  %s2762_s1 = inlined_call_operand.vmem [shape: s32[2,1], index: 1, kind: input, shape index: {}]   ;;  %s2763_s2 = inlined_call_operand.vmem [shape: f32[2,2,32], index: 2, kind: input, shape index: {}]   ;;  %s2764_s3 = inlined_call_operand.vmem [shape: f32[64,32], index: 3, kind: input, shape index: {}]   ;;  %s2765_s4 = inlined_call_operand.hbm [shape: f32[128,256], index: 4, kind: input, shape index: {}]   ;;  %s2766_s5 = inlined_call_operand.vmem [shape: f32[1,256], index: 5, kind: input, shape index: {}]   ;;  %s2767_s6 = inlined_call_operand.hbm [shape: f32[8,2,32], index: 6, kind: output, shape index: {0}]   ;;  %s2768_s7 = inlined_call_operand.hbm [shape: f32[2,2,32], index: 7, kind: output, shape index: {1}]  }
   0x1   :  { %14 = vsyncpa [#allocation4], 0 }
   0x2   :  { %15 = vsyncpa [#allocation7], 0  ;;  %s2082_s24 = smov [#allocation2]   ;;  %s2010_s28 = scalar_lea.hbm %s2765_s4, 4096 }
   0x3   :  { %s29_s25 = sshll.u32 %s2082_s24, 4  ;;  %p2011_p0 = scmp.ne.s32.totalorder %s2765_s4, %s2010_s28  ;;  %s30_s25 = int_to_ptr.vmem [resolvable:$true] %s29_s25 }
   0x4   :  { %p2014_p1 = scmp.lt.u32.totalorder %s2010_s28, %s2765_s4 }
   0x6   :  { %p2016_p2 = pnand %p2014_p1, %p2011_p0 }
   0x8   :  { %2019 = shalt.err (!%p2016_p2)
}
   0x9   :  { %s2020_s10 = scalar_lea.vmem %s30_s25, 4096  ;;  %p2025_p4 = scmp.lt.s32.totalorder %s30_s25, %s30_s25 }
   0xa   :  { %p2021_p3 = scmp.ne.s32.totalorder %s30_s25, %s2020_s10  ;;  %p2026_p5 = scmp.lt.s32.totalorder %s2020_s10, %s2020_s10 }
   0xc   :  { %p2027_p6 = por %p2026_p5, %p2025_p4 }
   0xe   :  { %p2028_p7 = pnand %p2027_p6, %p2021_p3 }
  0x10   :  { %2031 = shalt.err (!%p2028_p7)
}
  0x11   :  { %s2083_s11 = smov 256   ;;  %s2084_s12 = smov 16  }
  0x12   :  { %35 = dma.hbm_to_vmem [thread:$0]  %s2765_s4, 4096, %s30_s25, [#allocation3], %s2083_s11, %s2083_s11, %s2084_s12  }
  0x13   :  { %2076 = dma.done.wait [#allocation3], 4096  }
  0x14   :  { %2077 = vsyncadd [#allocation3], 4294963200  ;;  %v2085_v0 = vmov 0   ;;  %v41_v1 = vld [vmem:[%s2761_s0] sm:$0xff]  ;;  %v58_v3 = vld [vmem:[%s2764_s3 + $0x8] sm:$0xff]  ;;  %v2086_v9 = vmov 0.0   ;;  %v43_v17 = vlaneseq }
  0x15   :  { %1897 = vset.pattern.permute.xlu0 %v2085_v0  ;;  %1898 = vset.pattern.permute.xlu1 %v2085_v0  ;;  %v57_v2 = vld [vmem:[%s2764_s3] sm:$0xff]  ;;  %v59_v4 = vld [vmem:[%s2764_s3 + $0x10] sm:$0xff]  ;;  %v60_v5 = vld [vmem:[%s2764_s3 + $0x18] sm:$0xff]  ;;  %s2087_s12 = smov 32   ;;  %vm65_vm0 = vcmask 523264   ;;  %s2088_s14 = smov 96  }
  0x16   :  { %46 = vperm.xlu0 %1897, %v41_v1   ;;  %v42_v6 = vld [vmem:[%s2761_s0 + $0x8] sm:$0xff]  ;;  %v1614_v7 = vpack.c.bf16 %v58_v3, %v57_v2  ;;  %v1618_v8 = vpack.c.bf16 %v60_v5, %v59_v4  ;;  %277 = vmatprep.mubr.f32.mxu1 %v2086_v9  ;;  %v61_v10 = vld [vmem:[%s2764_s3 + $0x20] sm:$0xff]  ;;  %v63_v13 = vld [vmem:[%s2764_s3 + $0x30] sm:$0xff]  ;;  %v44_v18 = vand.u32 127, %v43_v17  ;;  %vm164_vm3 = vcmask 261120   ;;  %s2091_s19 = smov [#allocation6]  }
  0x17   :  { %v62_v11 = vld [vmem:[%s2764_s3 + $0x28] sm:$0xff]  ;;  %v64_v14 = vld [vmem:[%s2764_s3 + $0x38] sm:$0xff]  ;;  %v2179_v15 = vld [vmem:[%s2763_s2] sm:$0x3]  ;;  %vm167_vm4 = vcmask 785408   ;;  %vm1461_vm13 = vcmask 254976  }
  0x18   :  { %1615 = vmatprep.subr.bf16.mxu0 %v1614_v7  ;;  %v1622_v12 = vpack.c.bf16 %v62_v11, %v61_v10  ;;  %152 = vrot.lane.b32.xlu1 %v2179_v15, %s2087_s12  ;;  %v1626_v16 = vpack.c.bf16 %v64_v14, %v63_v13  ;;  %v2192_v23 = vld [vmem:[%s2763_s2 + $0x2] sm:$0x3]  ;;  %v170_v24 = vld [vmem:[#allocation2 + $0x8] sm:$0xff]  ;;  %v172_v25 = vld [vmem:[#allocation2 + $0x18] sm:$0xff]  ;;  %s2089_s2 = smov 64   ;;  %s1540_s20 = sshll.u32 %s2091_s19, 4  ;;  %s1541_s20 = int_to_ptr.vmem [resolvable:$true] %s1540_s20 }
  0x19   :  { %1617 = vmatpush3.bf16.msra.mxu0 %v1614_v7  ;;  %v2196_v26 = vpack.c.bf16 %v172_v25, %v170_v24  ;;  %v169_v27 = vld [vmem:[#allocation2] sm:$0xff]  ;;  %v171_v28 = vld [vmem:[#allocation2 + $0x10] sm:$0xff]  ;;  %v174_v29 = vld [vmem:[#allocation2 + $0x28] sm:$0xff] }
  0x1a   :  { %49 = vperm.xlu0 %1897, %v42_v6   ;;  %1619 = vmatprep.subr.bf16.mxu0 %v1618_v8  ;;  %v2198_v30 = vpack.c.bf16 %v171_v28, %v169_v27  ;;  %v176_v31 = vld [vmem:[#allocation2 + $0x38] sm:$0xff]  ;;  %v173_v32 = vld [vmem:[#allocation2 + $0x20] sm:$0xff]  ;;  %v175_v33 = vld [vmem:[#allocation2 + $0x30] sm:$0xff] }
  0x1b   :  { %1631 = vmatprep.subr.bf16.mxu1 %v2196_v26  ;;  %v2201_v34 = vpack.c.bf16 %v176_v31, %v174_v29  ;;  %v178_v35 = vld [vmem:[#allocation2 + $0x48] sm:$0xff]  ;;  %v180_v36 = vld [vmem:[#allocation2 + $0x58] sm:$0xff]  ;;  %v2205_v37 = vpack.c.bf16 %v175_v33, %v173_v32  ;;  %v177_v39 = vld [vmem:[#allocation2 + $0x40] sm:$0xff] }
  0x1c   :  { %1633 = vmatpush1.bf16.msra.mxu1 %v2198_v30  ;;  %v2209_v38 = vpack.c.bf16 %v180_v36, %v178_v35  ;;  %v179_v40 = vld [vmem:[#allocation2 + $0x50] sm:$0xff]  ;;  %v182_v41 = vld [vmem:[#allocation2 + $0x68] sm:$0xff]  ;;  %v184_v42 = vld [vmem:[#allocation2 + $0x78] sm:$0xff] }
  0x1d   :  { %1621 = vmatpush3.bf16.msra.mxu0 %v1618_v8  ;;  %1635 = vmatprep.subr.bf16.mxu1 %v2201_v34  ;;  %v2213_v43 = vpack.c.bf16 %v179_v40, %v177_v39  ;;  %v2217_v44 = vpack.c.bf16 %v184_v42, %v182_v41  ;;  %v181_v45 = vld [vmem:[#allocation2 + $0x60] sm:$0xff]  ;;  %v183_v46 = vld [vmem:[#allocation2 + $0x70] sm:$0xff]  ;;  %v186_v47 = vld [vmem:[#allocation2 + $0x88] sm:$0xff] }
  0x1e   :  { %1623 = vmatprep.subr.bf16.mxu0 %v1622_v12  ;;  %161 = vrot.lane.b32.xlu0 %v2192_v23, %s2088_s14  ;;  %v188_v48 = vld [vmem:[#allocation2 + $0x98] sm:$0xff]  ;;  %v2221_v49 = vpack.c.bf16 %v183_v46, %v181_v45  ;;  %v185_v51 = vld [vmem:[#allocation2 + $0x80] sm:$0xff]  ;;  %v187_v52 = vld [vmem:[#allocation2 + $0x90] sm:$0xff] }
  0x1f   :  { %v2225_v50 = vpack.c.bf16 %v188_v48, %v186_v47  ;;  %v190_v53 = vld [vmem:[#allocation2 + $0xa8] sm:$0xff]  ;;  %v192_v54 = vld [vmem:[#allocation2 + $0xb8] sm:$0xff]  ;;  %v2229_v55 = vpack.c.bf16 %v187_v52, %v185_v51  ;;  %v189_v57 = vld [vmem:[#allocation2 + $0xa0] sm:$0xff] }
  0x20   :  { %1637 = vmatpush1.bf16.msra.mxu1 %v2205_v37  ;;  %v2233_v56 = vpack.c.bf16 %v192_v54, %v190_v53  ;;  %v191_v58 = vld [vmem:[#allocation2 + $0xb0] sm:$0xff]  ;;  %v194_v59 = vld [vmem:[#allocation2 + $0xc8] sm:$0xff]  ;;  %v196_v60 = vld [vmem:[#allocation2 + $0xd8] sm:$0xff] }
  0x21   :  { %1625 = vmatpush3.bf16.msra.mxu0 %v1622_v12  ;;  %1639 = vmatprep.subr.bf16.mxu1 %v2209_v38  ;;  %v2237_v61 = vpack.c.bf16 %v191_v58, %v189_v57  ;;  %v2241_v62 = vpack.c.bf16 %v196_v60, %v194_v59  ;;  %v193_v63 = vld [vmem:[#allocation2 + $0xc0] sm:$0xff]  ;;  %v195_v0 = vld [vmem:[#allocation2 + $0xd0] sm:$0xff]  ;;  %v198_v1 = vld [vmem:[#allocation2 + $0xe8] sm:$0xff] }
  0x22   :  { %1627 = vmatprep.subr.bf16.mxu0 %v1626_v16  ;;  %v200_v2 = vld [vmem:[#allocation2 + $0xf8] sm:$0xff]  ;;  %v2245_v3 = vpack.c.bf16 %v195_v0, %v193_v63  ;;  %v197_v5 = vld [vmem:[#allocation2 + $0xe0] sm:$0xff]  ;;  %v199_v6 = vld [vmem:[#allocation2 + $0xf0] sm:$0xff] }
  0x23   :  { %v2249_v4 = vpack.c.bf16 %v200_v2, %v198_v1  ;;  %v2253_v7 = vpack.c.bf16 %v199_v6, %v197_v5  ;;  %v2302_v25 = vld [vmem:[%s2762_s1] sm:$0x3]  ;;  %s2090_s1 = smov [#allocation5]  }
  0x24   :  { %1641 = vmatpush1.bf16.msra.mxu1 %v2213_v43  ;;  %vm340_vm5 = vcmp.gt.s32.totalorder %v2302_v25, 7  ;;  %vm337_vm6 = vcmp.gt.s32.totalorder %v2302_v25, 0  ;;  %vm521_vm7 = vcmp.gt.s32.totalorder %v2302_v25, 6  ;;  %vm518_vm8 = vcmp.gt.s32.totalorder %v2302_v25, 1 }
  0x25   :  { %1629 = vmatpush3.bf16.msra.mxu0 %v1626_v16  ;;  %1643 = vmatprep.subr.bf16.mxu1 %v2217_v44  ;;  %v1563_v36 = vsel %vm337_vm6, 1.0, %v2086_v9  ;;  %vm690_vm9 = vcmp.gt.s32.totalorder %v2302_v25, 5  ;;  %vm687_vm10 = vcmp.gt.s32.totalorder %v2302_v25, 2  ;;  %vm859_vm11 = vcmp.gt.s32.totalorder %v2302_v25, 4 }
  0x26   :  { %1663 = vmatprep.subr.bf16.mxu0 %v2196_v26  ;;  %v349_v39 = vsub.f32 1.0, %v1563_v36  ;;  %vm856_vm12 = vcmp.gt.s32.totalorder %v2302_v25, 3 }
  0x28   :  { %1645 = vmatpush1.bf16.msra.mxu1 %v2221_v49 }
  0x29   :  { %1647 = vmatprep.subr.bf16.mxu1 %v2225_v50 }
  0x2c   :  { %1649 = vmatpush1.bf16.msra.mxu1 %v2229_v55 }
  0x2d   :  { %1651 = vmatprep.subr.bf16.mxu1 %v2233_v56 }
  0x30   :  { %1653 = vmatpush1.bf16.msra.mxu1 %v2237_v61 }
  0x31   :  { %1655 = vmatprep.subr.bf16.mxu1 %v2241_v62 }
  0x34   :  { %1657 = vmatpush1.bf16.msra.mxu1 %v2245_v3 }
  0x35   :  { %1659 = vmatprep.subr.bf16.mxu1 %v2249_v4 }
  0x38   :  { %1661 = vmatpush1.bf16.msra.mxu1 %v2253_v7 }
  0x39   :  { %1695 = vmatprep.subr.bf16.mxu1 %v2196_v26 }
  0x8a   :  { %v2268_v12 = vpop.permute.xlu1 %152 }
  0x95   :  { %v47_v19 = vpop.permute.xlu0 %46 }
  0x96   :  { %vm51_vm1 = vcmp.eq.s32.totalorder %v44_v18, %v47_v19 }
  0x97   :  { %v1556_v20 = vsel %vm51_vm1, 1.0, %v2086_v9 }
  0x98   :  { %1611 = vmatprep.mubr.msk.f32.mxu0 %vm65_vm0, %v1556_v20  ;;  %v204_v20 = vshrl.u32 %v43_v17, 7  ;;  %v1564_v17 = vsel %vm340_vm5, 1.0, %v2086_v9 }
  0x99   :  { %v50_v21 = vpop.permute.xlu0 %49  ;;  %v367_v35 = vsub.f32 1.0, %v1564_v17 }
  0x9a   :  { %vm52_vm2 = vcmp.eq.s32.totalorder %v44_v18, %v50_v21  ;;  %v205_v21 = vsub.s32 0, %v204_v20  ;;  %v209_v24 = vsub.s32 1, %v204_v20 }
  0x9b   :  { %v1557_v22 = vsel %vm52_vm2, 1.0, %v2086_v9 }
  0x9c   :  { %1612 = vmatmul.mubr.msk.f32.vlgmr.msra.gmra.mrb[0].mxu0 %vm65_vm0, %v1557_v22  ;;  %v201_v22 = vld [vmem:[%s2766_s5] sm:$0x3]  ;;  %s1528_s5 = sshll.u32 %s2090_s1, 4  ;;  %s1529_s5 = int_to_ptr.vmem [resolvable:$true] %s1528_s5 }
  0x9d   :  { %461 = vmatprep.mubr.f32.mxu0 %v2086_v9  ;;  %1665 = vmatpush1.bf16.msra.mxu0 %v2198_v30  ;;  %v162_v13 = vpop.permute.xlu0 %161  ;;  %v2304_v27 = vrot.slane %v201_v22, %v205_v21  ;;  %v2307_v28 = vrot.slane %v201_v22, %v209_v24  ;;  %s2032_s21 = scalar_lea.vmem %s1529_s5, 256  ;;  %p2037_p9 = scmp.lt.s32.totalorder %s1529_s5, %s1529_s5 }
  0x9e   :  { %1667 = vmatprep.subr.bf16.mxu0 %v2201_v34  ;;  %p2033_p8 = scmp.ne.s32.totalorder %s1529_s5, %s2032_s21  ;;  %p2038_p10 = scmp.lt.s32.totalorder %s2032_s21, %s2032_s21 }
  0xa0   :  { %p2039_p11 = por %p2038_p10, %p2037_p9 }
  0xa1   :  { %1669 = vmatpush1.bf16.msra.mxu0 %v2205_v37 }
  0xa2   :  { %1671 = vmatprep.subr.bf16.mxu0 %v2209_v38  ;;  %p2040_p12 = pnand %p2039_p11, %p2033_p8 }
  0xa5   :  { %1673 = vmatpush1.bf16.msra.mxu0 %v2213_v43 }
  0xa6   :  { %1675 = vmatprep.subr.bf16.mxu0 %v2217_v44 }
  0xa9   :  { %1677 = vmatpush1.bf16.msra.mxu0 %v2221_v49 }
  0xaa   :  { %1679 = vmatprep.subr.bf16.mxu0 %v2225_v50 }
  0xad   :  { %1681 = vmatpush1.bf16.msra.mxu0 %v2229_v55 }
  0xae   :  { %1683 = vmatprep.subr.bf16.mxu0 %v2233_v56 }
  0xb1   :  { %1685 = vmatpush1.bf16.msra.mxu0 %v2237_v61 }
  0xb2   :  { %1687 = vmatprep.subr.bf16.mxu0 %v2241_v62 }
  0xb5   :  { %1689 = vmatpush1.bf16.msra.mxu0 %v2245_v3 }
  0xb6   :  { %1691 = vmatprep.subr.bf16.mxu0 %v2249_v4 }
  0xb9   :  { %1693 = vmatpush1.bf16.msra.mxu0 %v2253_v7 }
  0xba   :  { %1727 = vmatprep.subr.bf16.mxu0 %v2196_v26 }
 0x16f   :  { %v2262_v8 = vpop.f32.mrb[0].mxu0 }
 0x170   :  { %v2264_v10 = vpop.f32.mrb[1].mxu0  ;;  %v156_v11 = vrot.slane %v2262_v8, 6 }
 0x171   :  { %v165_v16 = vsel %vm164_vm3, %v2264_v10, %v2268_v12 }
 0x172   :  { %157 = vrot.lane.b32.xlu1 %v156_v11, %s2089_s2 }
 0x1e4   :  { %v2270_v14 = vpop.permute.xlu1 %157 }
 0x1e5   :  { %v166_v18 = vsel %vm65_vm0, %v165_v16, %v2270_v14 }
 0x1e6   :  { %v168_v19 = vsel %vm167_vm4, %v166_v18, %v162_v13 }
 0x1e7   :  { %278 = vmatmul.mubr.f32.vlgmr.msra.gmra.mrb[0].mxu1 %v168_v19 }
 0x1e8   :  { %1697 = vmatpush1.bf16.msra.mxu1 %v2198_v30  ;;  %630 = vmatprep.mubr.f32.mxu1 %v2086_v9 }
 0x1e9   :  { %1699 = vmatprep.subr.bf16.mxu1 %v2201_v34 }
 0x1ec   :  { %1701 = vmatpush1.bf16.msra.mxu1 %v2205_v37 }
 0x1ed   :  { %1703 = vmatprep.subr.bf16.mxu1 %v2209_v38 }
 0x1f0   :  { %1705 = vmatpush1.bf16.msra.mxu1 %v2213_v43 }
 0x1f1   :  { %1707 = vmatprep.subr.bf16.mxu1 %v2217_v44 }
 0x1f4   :  { %1709 = vmatpush1.bf16.msra.mxu1 %v2221_v49 }
 0x1f5   :  { %1711 = vmatprep.subr.bf16.mxu1 %v2225_v50 }
 0x1f8   :  { %1713 = vmatpush1.bf16.msra.mxu1 %v2229_v55 }
 0x1f9   :  { %1715 = vmatprep.subr.bf16.mxu1 %v2233_v56 }
 0x1fc   :  { %1717 = vmatpush1.bf16.msra.mxu1 %v2237_v61 }
 0x1fd   :  { %1719 = vmatprep.subr.bf16.mxu1 %v2241_v62 }
 0x200   :  { %1721 = vmatpush1.bf16.msra.mxu1 %v2245_v3 }
 0x201   :  { %1723 = vmatprep.subr.bf16.mxu1 %v2249_v4 }
 0x204   :  { %1725 = vmatpush1.bf16.msra.mxu1 %v2253_v7 }
 0x205   :  { %1759 = vmatprep.subr.bf16.mxu1 %v2196_v26 }
 0x2ba   :  { %v279_v29 = vpop.f32.mrb[0].mxu1 }
 0x2bb   :  { %v280_v31 = vadd.f32 %v279_v29, %v2304_v27  ;;  %v281_v32 = vpop.f32.mrb[1].mxu1 }
 0x2bc   :  { %v282_v33 = vadd.f32 %v281_v32, %v2307_v28 }
 0x2bd   :  { %291 = vrot.lane.b32.xlu0 %v280_v31, %s2087_s12  ;;  %v1561_v41 = vmul.f32 -1.442695, %v280_v31 }
 0x2be   :  { %316 = vrot.lane.b32.xlu1 %v282_v33, %s2087_s12  ;;  %v1562_v40 = vmul.f32 -1.442695, %v282_v33 }
 0x2c0   :  { %1914 = vpow2.f32 %v1562_v40 }
 0x2c1   :  { %370 = vperm.xlu0 %1897, %v367_v35   ;;  %1916 = vpow2.f32 %v1561_v41 }
 0x2c5   :  { %352 = vperm.xlu0 %1897, %v349_v39  }
 0x2ca   :  { %v1915_v42 = vpop.eup %1914 }
 0x2cb   :  { %v312_v45 = vadd.f32 1.0, %v1915_v42  ;;  %v1917_v46 = vpop.eup %1916 }
 0x2cc   :  { %v287_v47 = vadd.f32 1.0, %v1917_v46 }
 0x2cd   :  { %1918 = vrcp.f32 %v312_v45 }
 0x2ce   :  { %1920 = vrcp.f32 %v287_v47 }
 0x2d7   :  { %v1919_v48 = vpop.eup %1918 }
 0x2d8   :  { %v1921_v54 = vpop.eup %1920  ;;  %v326_v16 = vsub.f32 1.0, %v1919_v48 }
 0x32f   :  { %v292_v53 = vpop.permute.xlu0 %291 }
 0x330   :  { %v317_v51 = vpop.permute.xlu1 %316  ;;  %v294_v57 = vmul.f32 %v1921_v54, %v292_v53 }
 0x331   :  { %v319_v52 = vmul.f32 %v1919_v48, %v317_v51 }
 0x333   :  { %321 = vrot.lane.b32.xlu1 %v319_v52, %s2089_s2 }
 0x337   :  { %296 = vrot.lane.b32.xlu1 %v294_v57, %s2089_s2 }
 0x33b   :  { %363 = vperm.xlu1 %1898, %v1564_v17   ;;  %v382_v17 = vrot.slane %v2262_v8, 2 }
 0x33f   :  { %332 = vrot.lane.b32.xlu1 %v2192_v23, %s2087_s12 }
 0x340   :  { %v2320_v58 = vpop.permute.xlu0 %370 }
 0x341   :  { %v373_v6 = vmul.f32 %v2192_v23, %v2320_v58 }
 0x343   :  { %345 = vperm.xlu1 %1898, %v1563_v36   ;;  %v307_v36 = vmul.f32 %v1921_v54, %v2268_v12 }
 0x344   :  { %v2322_v59 = vpop.permute.xlu0 %352 }
 0x345   :  { %v355_v60 = vmul.f32 %v2322_v59, %v2179_v15 }
 0x347   :  { %357 = vrot.lane.b32.xlu1 %v355_v60, %s2087_s12 }
 0x3a5   :  { %v322_v63 = vpop.permute.xlu1 %321 }
 0x3a6   :  { %v324_v0 = vadd.f32 %v322_v63, %v282_v33  ;;  %v301_v33 = vsub.f32 1.0, %v1921_v54 }
 0x3a8   :  { %1922 = vtanh.f32 %v324_v0 }
 0x3a9   :  { %v297_v1 = vpop.permute.xlu1 %296 }
 0x3aa   :  { %v299_v2 = vadd.f32 %v297_v1, %v280_v31 }
 0x3ac   :  { %1924 = vtanh.f32 %v299_v2 }
 0x3b2   :  { %v1923_v5 = vpop.eup %1922 }
 0x3b3   :  { %328 = vrot.lane.b32.xlu0 %v1923_v5, %s2088_s14 }
 0x3b6   :  { %v1925_v11 = vpop.eup %1924 }
 0x3b7   :  { %375 = vrot.lane.b32.xlu0 %v373_v6, %s2087_s12 }
 0x3ba   :  { %v2332_v15 = vpop.permute.xlu1 %363 }
 0x3bb   :  { %303 = vrot.lane.b32.xlu0 %v1925_v11, %s2088_s14 }
 0x3be   :  { %v333_v13 = vpop.permute.xlu1 %332 }
 0x3bf   :  { %v335_v19 = vmul.f32 %v1919_v48, %v333_v13 }
 0x3c2   :  { %v2344_v40 = vpop.permute.xlu1 %345 }
 0x3c6   :  { %v358_v42 = vpop.permute.xlu1 %357 }
 0x425   :  { %v329_v18 = vpop.permute.xlu0 %328 }
 0x426   :  { %v331_v20 = vmul.f32 %v329_v18, %v326_v16 }
 0x428   :  { %v336_v21 = vadd.f32 %v335_v19, %v331_v20  ;;  %v1568_v19 = vsel %vm521_vm7, 1.0, %v2086_v9 }
 0x429   :  { %v376_v24 = vpop.permute.xlu0 %375 }
 0x42a   :  { %v2335_v22 = vmul.f32 %v2332_v15, %v336_v21 }
 0x42c   :  { %v2338_v29 = vadd.f32 %v376_v24, %v2335_v22 }
 0x42d   :  { %v304_v32 = vpop.permute.xlu0 %303 }
 0x42e   :  { %v387_v23 = vrot.slane %v2338_v29, 6  ;;  %v306_v35 = vmul.f32 %v304_v32, %v301_v33 }
 0x430   :  { %v1899_v31 = vpack.i.bf16 %v387_v23, %v382_v17  ;;  %v308_v39 = vadd.f32 %v307_v36, %v306_v35  ;;  %v544_v17 = vsub.f32 1.0, %v1568_v19 }
 0x432   :  { %1900 = vrot.lane.b32.xlu0 %v1899_v31, %s2089_s2  ;;  %v2347_v41 = vmul.f32 %v2344_v40, %v308_v39  ;;  %v1567_v31 = vsel %vm518_vm8, 1.0, %v2086_v9 }
 0x434   :  { %v2350_v45 = vadd.f32 %v358_v42, %v2347_v41 }
 0x436   :  { %v380_v46 = vrot.slane %v2350_v45, 6 }
 0x438   :  { %v391_v12 = vsel %vm164_vm3, %v2264_v10, %v380_v46  ;;  %v530_v46 = vsub.f32 1.0, %v1567_v31 }
 0x4a4   :  { %v2353_v47 = vpop.permute.xlu0 %1900 }
 0x4a5   :  { %v1903_v48 = vunpack.i.h.bf16 %v2353_v47  ;;  %v1902_v51 = vunpack.i.l.bf16 %v2353_v47 }
 0x4a7   :  { %v392_v52 = vsel %vm65_vm0, %v391_v12, %v1902_v51 }
 0x4a8   :  { %v393_v53 = vsel %vm167_vm4, %v392_v52, %v1903_v48 }
 0x4a9   :  { %v395_v54 = vrot.slane %v393_v53, 2 }
 0x4ab   :  { %462 = vmatmul.mubr.f32.vlgmr.msra.gmra.mrb[2].mxu0 %v395_v54 }
 0x4ac   :  { %1729 = vmatpush1.bf16.msra.mxu0 %v2198_v30  ;;  %799 = vmatprep.mubr.f32.mxu0 %v2086_v9 }
 0x4ad   :  { %1731 = vmatprep.subr.bf16.mxu0 %v2201_v34 }
 0x4b0   :  { %1733 = vmatpush1.bf16.msra.mxu0 %v2205_v37 }
 0x4b1   :  { %1735 = vmatprep.subr.bf16.mxu0 %v2209_v38 }
 0x4b4   :  { %1737 = vmatpush1.bf16.msra.mxu0 %v2213_v43 }
 0x4b5   :  { %1739 = vmatprep.subr.bf16.mxu0 %v2217_v44 }
 0x4b8   :  { %1741 = vmatpush1.bf16.msra.mxu0 %v2221_v49 }
 0x4b9   :  { %1743 = vmatprep.subr.bf16.mxu0 %v2225_v50 }
 0x4bc   :  { %1745 = vmatpush1.bf16.msra.mxu0 %v2229_v55 }
 0x4bd   :  { %1747 = vmatprep.subr.bf16.mxu0 %v2233_v56 }
 0x4c0   :  { %1749 = vmatpush1.bf16.msra.mxu0 %v2237_v61 }
 0x4c1   :  { %1751 = vmatprep.subr.bf16.mxu0 %v2241_v62 }
 0x4c4   :  { %1753 = vmatpush1.bf16.msra.mxu0 %v2245_v3 }
 0x4c5   :  { %1755 = vmatprep.subr.bf16.mxu0 %v2249_v4 }
 0x4c8   :  { %1757 = vmatpush1.bf16.msra.mxu0 %v2253_v7 }
 0x4c9   :  { %1791 = vmatprep.subr.bf16.mxu0 %v2196_v26 }
 0x57e   :  { %v463_v57 = vpop.f32.mrb[2].mxu0 }
 0x57f   :  { %v464_v60 = vadd.f32 %v463_v57, %v2304_v27  ;;  %v465_v63 = vpop.f32.mrb[3].mxu0 }
 0x580   :  { %v466_v0 = vadd.f32 %v465_v63, %v2307_v28 }
 0x581   :  { %475 = vrot.lane.b32.xlu0 %v464_v60, %s2087_s12  ;;  %v1565_v1 = vmul.f32 -1.442695, %v464_v60 }
 0x582   :  { %500 = vrot.lane.b32.xlu1 %v466_v0, %s2087_s12  ;;  %v1566_v2 = vmul.f32 -1.442695, %v466_v0 }
 0x583   :  { %1926 = vpow2.f32 %v1565_v1 }
 0x584   :  { %1928 = vpow2.f32 %v1566_v2 }
 0x58d   :  { %v1927_v5 = vpop.eup %1926 }
 0x58e   :  { %v1929_v6 = vpop.eup %1928  ;;  %v471_v11 = vadd.f32 1.0, %v1927_v5 }
 0x58f   :  { %v496_v13 = vadd.f32 1.0, %v1929_v6 }
 0x590   :  { %1930 = vrcp.f32 %v471_v11 }
 0x591   :  { %1932 = vrcp.f32 %v496_v13 }
 0x59a   :  { %v1931_v16 = vpop.eup %1930 }
 0x59b   :  { %v1933_v20 = vpop.eup %1932  ;;  %v485_v11 = vsub.f32 1.0, %v1931_v16 }
 0x59c   :  { %v510_v12 = vsub.f32 1.0, %v1933_v20  ;;  %v516_v53 = vmul.f32 %v1933_v20, %v2338_v29 }
 0x5f3   :  { %v476_v18 = vpop.permute.xlu0 %475 }
 0x5f4   :  { %v478_v21 = vmul.f32 %v1931_v16, %v476_v18  ;;  %v501_v24 = vpop.permute.xlu1 %500  ;;  %v491_v18 = vmul.f32 %v1931_v16, %v2350_v45 }
 0x5f5   :  { %v503_v23 = vmul.f32 %v1933_v20, %v501_v24 }
 0x5f6   :  { %480 = vrot.lane.b32.xlu0 %v478_v21, %s2089_s2 }
 0x5f7   :  { %505 = vrot.lane.b32.xlu1 %v503_v23, %s2089_s2 }
 0x5fa   :  { %547 = vperm.xlu0 %1897, %v544_v17  }
 0x5fb   :  { %540 = vperm.xlu1 %1898, %v1568_v19  }
 0x5fe   :  { %526 = vperm.xlu0 %1897, %v1567_v31  }
 0x668   :  { %v481_v32 = vpop.permute.xlu0 %480 }
 0x669   :  { %v483_v33 = vadd.f32 %v481_v32, %v464_v60  ;;  %v506_v35 = vpop.permute.xlu1 %505 }
 0x66a   :  { %v508_v36 = vadd.f32 %v506_v35, %v466_v0 }
 0x66b   :  { %1934 = vtanh.f32 %v483_v33 }
 0x66c   :  { %1936 = vtanh.f32 %v508_v36 }
 0x675   :  { %v1935_v39 = vpop.eup %1934 }
 0x676   :  { %v1937_v42 = vpop.eup %1936  ;;  %487 = vrot.lane.b32.xlu0 %v1935_v39, %s2088_s14 }
 0x677   :  { %512 = vrot.lane.b32.xlu1 %v1937_v42, %s2088_s14 }
 0x679   :  { %v2395_v57 = vpop.permute.xlu0 %547 }
 0x67a   :  { %v2392_v48 = vpop.permute.xlu1 %540  ;;  %v550_v63 = vmul.f32 %v2395_v57, %v2338_v29 }
 0x67b   :  { %533 = vperm.xlu1 %1898, %v530_v46  }
 0x67d   :  { %v2407_v5 = vpop.permute.xlu0 %526 }
 0x6e8   :  { %v488_v6 = vpop.permute.xlu0 %487 }
 0x6e9   :  { %v513_v52 = vpop.permute.xlu1 %512  ;;  %v490_v13 = vmul.f32 %v488_v6, %v485_v11 }
 0x6ea   :  { %v515_v54 = vmul.f32 %v513_v52, %v510_v12 }
 0x6eb   :  { %v492_v29 = vadd.f32 %v491_v18, %v490_v13 }
 0x6ec   :  { %v517_v60 = vadd.f32 %v516_v53, %v515_v54 }
 0x6ed   :  { %v2415_v21 = vmul.f32 %v2407_v5, %v492_v29  ;;  %v1571_v29 = vsel %vm687_vm10, 1.0, %v2086_v9 }
 0x6ee   :  { %v2400_v0 = vmul.f32 %v2392_v48, %v517_v60 }
 0x6f0   :  { %v2403_v1 = vadd.f32 %v550_v63, %v2400_v0  ;;  %v1572_v63 = vsel %vm690_vm9, 1.0, %v2086_v9 }
 0x6f1   :  { %v713_v18 = vsub.f32 1.0, %v1572_v63 }
 0x6f2   :  { %v556_v2 = vrot.slane %v2403_v1, 4 }
 0x6f4   :  { %557 = vrot.lane.b32.xlu1 %v556_v2, %s2089_s2 }
 0x6fa   :  { %v2410_v19 = vpop.permute.xlu1 %533 }
 0x6fb   :  { %v536_v20 = vmul.f32 %v2410_v19, %v2350_v45 }
 0x6fd   :  { %v2418_v24 = vadd.f32 %v536_v20, %v2415_v21 }
 0x6ff   :  { %v553_v23 = vrot.slane %v2418_v24, 4 }
 0x701   :  { %v560_v17 = vsel %vm164_vm3, %v2264_v10, %v553_v23 }
 0x702   :  { %v561_v16 = vsel %vm65_vm0, %v560_v17, %v2270_v14 }
 0x766   :  { %v558_v31 = vpop.permute.xlu1 %557 }
 0x767   :  { %v562_v32 = vsel %vm167_vm4, %v561_v16, %v558_v31 }
 0x768   :  { %v564_v33 = vrot.slane %v562_v32, 4 }
 0x76a   :  { %631 = vmatmul.mubr.f32.vlgmr.msra.gmra.mrb[2].mxu1 %v564_v33  ;;  %v699_v33 = vsub.f32 1.0, %v1571_v29 }
 0x76b   :  { %1761 = vmatpush1.bf16.msra.mxu1 %v2198_v30  ;;  %966 = vmatprep.mubr.f32.mxu1 %v2086_v9 }
 0x76c   :  { %1763 = vmatprep.subr.bf16.mxu1 %v2201_v34 }
 0x76f   :  { %1765 = vmatpush1.bf16.msra.mxu1 %v2205_v37 }
 0x770   :  { %1767 = vmatprep.subr.bf16.mxu1 %v2209_v38 }
 0x773   :  { %1769 = vmatpush1.bf16.msra.mxu1 %v2213_v43 }
 0x774   :  { %1771 = vmatprep.subr.bf16.mxu1 %v2217_v44 }
 0x777   :  { %1773 = vmatpush1.bf16.msra.mxu1 %v2221_v49 }
 0x778   :  { %1775 = vmatprep.subr.bf16.mxu1 %v2225_v50 }
 0x77b   :  { %1777 = vmatpush1.bf16.msra.mxu1 %v2229_v55 }
 0x77c   :  { %1779 = vmatprep.subr.bf16.mxu1 %v2233_v56 }
 0x77f   :  { %1781 = vmatpush1.bf16.msra.mxu1 %v2237_v61 }
 0x780   :  { %1783 = vmatprep.subr.bf16.mxu1 %v2241_v62 }
 0x783   :  { %1785 = vmatpush1.bf16.msra.mxu1 %v2245_v3 }
 0x784   :  { %1787 = vmatprep.subr.bf16.mxu1 %v2249_v4 }
 0x787   :  { %1789 = vmatpush1.bf16.msra.mxu1 %v2253_v7 }
 0x788   :  { %1823 = vmatprep.subr.bf16.mxu1 %v2196_v26 }
 0x83d   :  { %v632_v14 = vpop.f32.mrb[2].mxu1 }
 0x83e   :  { %v633_v45 = vadd.f32 %v632_v14, %v2304_v27  ;;  %v634_v35 = vpop.f32.mrb[3].mxu1 }
 0x83f   :  { %v635_v36 = vadd.f32 %v634_v35, %v2307_v28 }
 0x840   :  { %644 = vrot.lane.b32.xlu1 %v633_v45, %s2087_s12  ;;  %v1569_v39 = vmul.f32 -1.442695, %v633_v45 }
 0x841   :  { %669 = vrot.lane.b32.xlu0 %v635_v36, %s2087_s12  ;;  %v1570_v42 = vmul.f32 -1.442695, %v635_v36 }
 0x842   :  { %1938 = vpow2.f32 %v1569_v39 }
 0x843   :  { %1940 = vpow2.f32 %v1570_v42 }
 0x84c   :  { %v1939_v46 = vpop.eup %1938 }
 0x84d   :  { %v1941_v12 = vpop.eup %1940  ;;  %v640_v52 = vadd.f32 1.0, %v1939_v46 }
 0x84e   :  { %v665_v53 = vadd.f32 1.0, %v1941_v12 }
 0x84f   :  { %1942 = vrcp.f32 %v640_v52 }
 0x850   :  { %1944 = vrcp.f32 %v665_v53 }
 0x859   :  { %v1943_v54 = vpop.eup %1942 }
 0x85a   :  { %v1945_v2 = vpop.eup %1944 }
 0x85b   :  { %v679_v35 = vsub.f32 1.0, %v1945_v2  ;;  %v685_v42 = vmul.f32 %v1945_v2, %v2403_v1 }
 0x8b2   :  { %v645_v60 = vpop.permute.xlu1 %644 }
 0x8b3   :  { %v647_v6 = vmul.f32 %v1943_v54, %v645_v60  ;;  %v670_v11 = vpop.permute.xlu0 %669 }
 0x8b4   :  { %v672_v13 = vmul.f32 %v1945_v2, %v670_v11 }
 0x8b5   :  { %649 = vrot.lane.b32.xlu1 %v647_v6, %s2089_s2  ;;  %v654_v6 = vsub.f32 1.0, %v1943_v54 }
 0x8b6   :  { %674 = vrot.lane.b32.xlu0 %v672_v13, %s2089_s2  ;;  %v660_v13 = vmul.f32 %v1943_v54, %v2418_v24 }
 0x8b9   :  { %716 = vperm.xlu1 %1898, %v713_v18  }
 0x8ba   :  { %709 = vperm.xlu0 %1897, %v1572_v63  }
 0x8bd   :  { %695 = vperm.xlu1 %1898, %v1571_v29  }
 0x927   :  { %v650_v20 = vpop.permute.xlu1 %649 }
 0x928   :  { %v652_v23 = vadd.f32 %v650_v20, %v633_v45  ;;  %v675_v17 = vpop.permute.xlu0 %674 }
 0x929   :  { %v677_v31 = vadd.f32 %v675_v17, %v635_v36 }
 0x92a   :  { %1946 = vtanh.f32 %v652_v23 }
 0x92b   :  { %1948 = vtanh.f32 %v677_v31 }
 0x934   :  { %v1947_v16 = vpop.eup %1946 }
 0x935   :  { %v1949_v32 = vpop.eup %1948  ;;  %656 = vrot.lane.b32.xlu1 %v1947_v16, %s2088_s14 }
 0x936   :  { %681 = vrot.lane.b32.xlu0 %v1949_v32, %s2088_s14 }
 0x938   :  { %v2458_v45 = vpop.permute.xlu1 %716 }
 0x939   :  { %v2455_v14 = vpop.permute.xlu0 %709  ;;  %v719_v12 = vmul.f32 %v2458_v45, %v2403_v1 }
 0x93a   :  { %702 = vperm.xlu0 %1897, %v699_v33  }
 0x93c   :  { %v2470_v63 = vpop.permute.xlu1 %695 }
 0x9a7   :  { %v657_v2 = vpop.permute.xlu1 %656 }
 0x9a8   :  { %v682_v39 = vpop.permute.xlu0 %681  ;;  %v659_v11 = vmul.f32 %v657_v2, %v654_v6  ;;  %v1576_v6 = vsel %vm859_vm11, 1.0, %v2086_v9 }
 0x9a9   :  { %v684_v46 = vmul.f32 %v682_v39, %v679_v35 }
 0x9aa   :  { %v661_v1 = vadd.f32 %v660_v13, %v659_v11 }
 0x9ab   :  { %v686_v36 = vadd.f32 %v685_v42, %v684_v46 }
 0x9ac   :  { %v2478_v20 = vmul.f32 %v2470_v63, %v661_v1 }
 0x9ad   :  { %v2463_v52 = vmul.f32 %v2455_v14, %v686_v36 }
 0x9af   :  { %v2466_v53 = vadd.f32 %v719_v12, %v2463_v52 }
 0x9b1   :  { %v725_v60 = vrot.slane %v2466_v53, 2 }
 0x9b3   :  { %726 = vrot.lane.b32.xlu0 %v725_v60, %s2089_s2 }
 0x9b9   :  { %v2473_v18 = vpop.permute.xlu0 %702 }
 0x9ba   :  { %v705_v29 = vmul.f32 %v2473_v18, %v2418_v24 }
 0x9bc   :  { %v2481_v23 = vadd.f32 %v705_v29, %v2478_v20 }
 0x9be   :  { %v722_v17 = vrot.slane %v2481_v23, 2 }
 0x9c0   :  { %v729_v31 = vsel %vm164_vm3, %v2264_v10, %v722_v17  ;;  %v882_v17 = vsub.f32 1.0, %v1576_v6 }
 0x9c1   :  { %v730_v54 = vsel %vm65_vm0, %v729_v31, %v1902_v51  ;;  %v1575_v31 = vsel %vm856_vm12, 1.0, %v2086_v9 }
 0xa25   :  { %v727_v16 = vpop.permute.xlu0 %726 }
 0xa26   :  { %v731_v32 = vsel %vm167_vm4, %v730_v54, %v727_v16 }
 0xa27   :  { %v733_v33 = vrot.slane %v731_v32, 6 }
 0xa29   :  { %800 = vmatmul.mubr.f32.vlgmr.msra.gmra.mrb[4].mxu0 %v733_v33 }
 0xa2a   :  { %1793 = vmatpush1.bf16.msra.mxu0 %v2198_v30  ;;  %1111 = vmatprep.mubr.f32.mxu0 %v2086_v9 }
 0xa2b   :  { %1795 = vmatprep.subr.bf16.mxu0 %v2201_v34 }
 0xa2e   :  { %1797 = vmatpush1.bf16.msra.mxu0 %v2205_v37 }
 0xa2f   :  { %1799 = vmatprep.subr.bf16.mxu0 %v2209_v38 }
 0xa32   :  { %1801 = vmatpush1.bf16.msra.mxu0 %v2213_v43 }
 0xa33   :  { %1803 = vmatprep.subr.bf16.mxu0 %v2217_v44 }
 0xa36   :  { %1805 = vmatpush1.bf16.msra.mxu0 %v2221_v49 }
 0xa37   :  { %1807 = vmatprep.subr.bf16.mxu0 %v2225_v50 }
 0xa3a   :  { %1809 = vmatpush1.bf16.msra.mxu0 %v2229_v55 }
 0xa3b   :  { %1811 = vmatprep.subr.bf16.mxu0 %v2233_v56 }
 0xa3e   :  { %1813 = vmatpush1.bf16.msra.mxu0 %v2237_v61 }
 0xa3f   :  { %1815 = vmatprep.subr.bf16.mxu0 %v2241_v62 }
 0xa42   :  { %1817 = vmatpush1.bf16.msra.mxu0 %v2245_v3 }
 0xa43   :  { %1819 = vmatprep.subr.bf16.mxu0 %v2249_v4 }
 0xa46   :  { %1821 = vmatpush1.bf16.msra.mxu0 %v2253_v7 }
 0xa47   :  { %1855 = vmatprep.subr.bf16.mxu0 %v2196_v26 }
 0xafc   :  { %v801_v47 = vpop.f32.mrb[4].mxu0 }
 0xafd   :  { %v802_v51 = vadd.f32 %v801_v47, %v2304_v27  ;;  %v803_v24 = vpop.f32.mrb[5].mxu0 }
 0xafe   :  { %v804_v35 = vadd.f32 %v803_v24, %v2307_v28 }
 0xaff   :  { %813 = vrot.lane.b32.xlu0 %v802_v51, %s2087_s12  ;;  %v1573_v39 = vmul.f32 -1.442695, %v802_v51 }
 0xb00   :  { %838 = vrot.lane.b32.xlu1 %v804_v35, %s2087_s12  ;;  %v1574_v42 = vmul.f32 -1.442695, %v804_v35 }
 0xb01   :  { %1950 = vpow2.f32 %v1573_v39  ;;  %v868_v39 = vsub.f32 1.0, %v1575_v31 }
 0xb02   :  { %1952 = vpow2.f32 %v1574_v42 }
 0xb0b   :  { %v1951_v46 = vpop.eup %1950 }
 0xb0c   :  { %v1953_v36 = vpop.eup %1952  ;;  %v809_v12 = vadd.f32 1.0, %v1951_v46 }
 0xb0d   :  { %v834_v60 = vadd.f32 1.0, %v1953_v36 }
 0xb0e   :  { %1954 = vrcp.f32 %v809_v12 }
 0xb0f   :  { %1956 = vrcp.f32 %v834_v60 }
 0xb18   :  { %v1955_v26 = vpop.eup %1954 }
 0xb19   :  { %v1957_v11 = vpop.eup %1956 }
 0xb1a   :  { %v848_v42 = vsub.f32 1.0, %v1957_v11  ;;  %v854_v36 = vmul.f32 %v1957_v11, %v2466_v53 }
 0xb71   :  { %v814_v2 = vpop.permute.xlu0 %813 }
 0xb72   :  { %v816_v13 = vmul.f32 %v1955_v26, %v814_v2  ;;  %v839_v1 = vpop.permute.xlu1 %838 }
 0xb73   :  { %v841_v29 = vmul.f32 %v1957_v11, %v839_v1 }
 0xb74   :  { %818 = vrot.lane.b32.xlu0 %v816_v13, %s2089_s2  ;;  %v891_v13 = vrot.slane %v2264_v10, 6 }
 0xb75   :  { %843 = vrot.lane.b32.xlu1 %v841_v29, %s2089_s2 }
 0xb78   :  { %885 = vperm.xlu0 %1897, %v882_v17   ;;  %v823_v17 = vsub.f32 1.0, %v1955_v26 }
 0xb79   :  { %878 = vperm.xlu1 %1898, %v1576_v6  }
 0xb7c   :  { %864 = vperm.xlu0 %1897, %v1575_v31  }
 0xbe6   :  { %v819_v16 = vpop.permute.xlu0 %818 }
 0xbe7   :  { %v821_v54 = vadd.f32 %v819_v16, %v802_v51  ;;  %v844_v32 = vpop.permute.xlu1 %843  ;;  %v829_v16 = vmul.f32 %v1955_v26, %v2481_v23 }
 0xbe8   :  { %v846_v33 = vadd.f32 %v844_v32, %v804_v35 }
 0xbe9   :  { %1958 = vtanh.f32 %v821_v54 }
 0xbea   :  { %1960 = vtanh.f32 %v846_v33 }
 0xbf3   :  { %v1959_v47 = vpop.eup %1958 }
 0xbf4   :  { %v1961_v24 = vpop.eup %1960  ;;  %825 = vrot.lane.b32.xlu0 %v1959_v47, %s2088_s14 }
 0xbf5   :  { %850 = vrot.lane.b32.xlu1 %v1961_v24, %s2088_s14 }
 0xbf7   :  { %v2522_v51 = vpop.permute.xlu0 %885 }
 0xbf8   :  { %v2519_v25 = vpop.permute.xlu1 %878  ;;  %v888_v60 = vmul.f32 %v2522_v51, %v2466_v53 }
 0xbf9   :  { %871 = vperm.xlu1 %1898, %v868_v39  }
 0xbfb   :  { %v2535_v11 = vpop.permute.xlu0 %864 }
 0xc66   :  { %v826_v29 = vpop.permute.xlu0 %825 }
 0xc67   :  { %v851_v46 = vpop.permute.xlu1 %850  ;;  %v828_v31 = vmul.f32 %v826_v29, %v823_v17 }
 0xc68   :  { %v853_v12 = vmul.f32 %v851_v46, %v848_v42 }
 0xc69   :  { %v830_v54 = vadd.f32 %v829_v16, %v828_v31 }
 0xc6a   :  { %v855_v35 = vadd.f32 %v854_v36, %v853_v12 }
 0xc6b   :  { %v2543_v33 = vmul.f32 %v2535_v11, %v830_v54 }
 0xc6c   :  { %v2527_v2 = vmul.f32 %v2519_v25, %v855_v35 }
 0xc6e   :  { %v2530_v6 = vadd.f32 %v888_v60, %v2527_v2 }
 0xc70   :  { %v1904_v1 = vpack.i.bf16 %v2530_v6, %v891_v13 }
 0xc72   :  { %1905 = vrot.lane.b32.xlu1 %v1904_v1, %s2089_s2 }
 0xc78   :  { %v2538_v53 = vpop.permute.xlu1 %871 }
 0xc79   :  { %v874_v32 = vmul.f32 %v2538_v53, %v2481_v23 }
 0xc7b   :  { %v2546_v47 = vadd.f32 %v874_v32, %v2543_v33 }
 0xc7d   :  { %v899_v26 = vsel %vm164_vm3, %v2262_v8, %v2546_v47 }
 0xce4   :  { %v2548_v24 = vpop.permute.xlu1 %1905 }
 0xce5   :  { %v1908_v39 = vunpack.i.h.bf16 %v2548_v24  ;;  %v1907_v42 = vunpack.i.l.bf16 %v2548_v24 }
 0xce7   :  { %v900_v23 = vsel %vm65_vm0, %v899_v26, %v1907_v42 }
 0xce8   :  { %v901_v46 = vsel %vm167_vm4, %v900_v23, %v1908_v39 }
 0xce9   :  { %967 = vmatmul.mubr.f32.vlgmr.msra.gmra.mrb[4].mxu1 %v901_v46 }
 0xcea   :  { %1825 = vmatpush1.bf16.msra.mxu1 %v2198_v30  ;;  %1252 = vmatprep.mubr.f32.mxu1 %v2086_v9 }
 0xceb   :  { %1827 = vmatprep.subr.bf16.mxu1 %v2201_v34 }
 0xcee   :  { %1829 = vmatpush1.bf16.msra.mxu1 %v2205_v37 }
 0xcef   :  { %1831 = vmatprep.subr.bf16.mxu1 %v2209_v38 }
 0xcf2   :  { %1833 = vmatpush1.bf16.msra.mxu1 %v2213_v43 }
 0xcf3   :  { %1835 = vmatprep.subr.bf16.mxu1 %v2217_v44 }
 0xcf6   :  { %1837 = vmatpush1.bf16.msra.mxu1 %v2221_v49 }
 0xcf7   :  { %1839 = vmatprep.subr.bf16.mxu1 %v2225_v50 }
 0xcfa   :  { %1841 = vmatpush1.bf16.msra.mxu1 %v2229_v55 }
 0xcfb   :  { %1843 = vmatprep.subr.bf16.mxu1 %v2233_v56 }
 0xcfe   :  { %1845 = vmatpush1.bf16.msra.mxu1 %v2237_v61 }
 0xcff   :  { %1847 = vmatprep.subr.bf16.mxu1 %v2241_v62 }
 0xd02   :  { %1849 = vmatpush1.bf16.msra.mxu1 %v2245_v3 }
 0xd03   :  { %1851 = vmatprep.subr.bf16.mxu1 %v2249_v4 }
 0xd06   :  { %1853 = vmatpush1.bf16.msra.mxu1 %v2253_v7 }
 0xdbc   :  { %v968_v36 = vpop.f32.mrb[4].mxu1 }
 0xdbd   :  { %v969_v12 = vadd.f32 %v968_v36, %v2304_v27  ;;  %v970_v35 = vpop.f32.mrb[5].mxu1 }
 0xdbe   :  { %v971_v60 = vadd.f32 %v970_v35, %v2307_v28 }
 0xdbf   :  { %980 = vrot.lane.b32.xlu1 %v969_v12, %s2087_s12  ;;  %v1577_v13 = vmul.f32 -1.442695, %v969_v12 }
 0xdc0   :  { %1005 = vrot.lane.b32.xlu0 %v971_v60, %s2087_s12  ;;  %v1578_v1 = vmul.f32 -1.442695, %v971_v60 }
 0xdc1   :  { %1962 = vpow2.f32 %v1577_v13 }
 0xdc2   :  { %1964 = vpow2.f32 %v1578_v1 }
 0xdcb   :  { %v1963_v29 = vpop.eup %1962 }
 0xdcc   :  { %v1965_v17 = vpop.eup %1964  ;;  %v976_v31 = vadd.f32 1.0, %v1963_v29 }
 0xdcd   :  { %v1001_v16 = vadd.f32 1.0, %v1965_v17 }
 0xdce   :  { %1966 = vrcp.f32 %v976_v31 }
 0xdcf   :  { %1968 = vrcp.f32 %v1001_v16 }
 0xdd8   :  { %v1967_v54 = vpop.eup %1966 }
 0xdd9   :  { %v1969_v39 = vpop.eup %1968 }
 0xdda   :  { %v1015_v31 = vsub.f32 1.0, %v1969_v39 }
 0xe31   :  { %v981_v32 = vpop.permute.xlu1 %980 }
 0xe32   :  { %v983_v26 = vmul.f32 %v1967_v54, %v981_v32  ;;  %v1006_v23 = vpop.permute.xlu0 %1005  ;;  %v1021_v32 = vmul.f32 %v1969_v39, %v2530_v6 }
 0xe33   :  { %v1008_v46 = vmul.f32 %v1969_v39, %v1006_v23  ;;  %v990_v39 = vsub.f32 1.0, %v1967_v54 }
 0xe34   :  { %985 = vrot.lane.b32.xlu1 %v983_v26, %s2089_s2 }
 0xe35   :  { %1010 = vrot.lane.b32.xlu0 %v1008_v46, %s2089_s2  ;;  %v1027_v46 = vmul.f32 %v2530_v6, %v2538_v53 }
 0xea6   :  { %v986_v36 = vpop.permute.xlu1 %985 }
 0xea7   :  { %v988_v35 = vadd.f32 %v986_v36, %v969_v12  ;;  %v1011_v13 = vpop.permute.xlu0 %1010  ;;  %v1032_v36 = vrot.slane %v2264_v10, 2 }
 0xea8   :  { %v1013_v1 = vadd.f32 %v1011_v13, %v971_v60 }
 0xea9   :  { %1970 = vtanh.f32 %v988_v35 }
 0xeaa   :  { %1972 = vtanh.f32 %v1013_v1 }
 0xeb3   :  { %v1971_v29 = vpop.eup %1970 }
 0xeb4   :  { %v1973_v17 = vpop.eup %1972  ;;  %992 = vrot.lane.b32.xlu1 %v1971_v29, %s2088_s14 }
 0xeb5   :  { %1017 = vrot.lane.b32.xlu0 %v1973_v17, %s2088_s14  ;;  %v996_v17 = vmul.f32 %v1967_v54, %v2546_v47 }
 0xf26   :  { %v993_v1 = vpop.permute.xlu1 %992 }
 0xf27   :  { %v1018_v16 = vpop.permute.xlu0 %1017  ;;  %v995_v29 = vmul.f32 %v993_v1, %v990_v39 }
 0xf28   :  { %v1020_v23 = vmul.f32 %v1018_v16, %v1015_v31 }
 0xf29   :  { %v997_v31 = vadd.f32 %v996_v17, %v995_v29 }
 0xf2a   :  { %v1022_v26 = vadd.f32 %v1021_v32, %v1020_v23 }
 0xf2b   :  { %v2597_v6 = vmul.f32 %v997_v31, %v2519_v25 }
 0xf2c   :  { %v2587_v12 = vmul.f32 %v1022_v26, %v2535_v11  ;;  %v1024_v11 = vmul.f32 %v2522_v51, %v2546_v47 }
 0xf2e   :  { %v2590_v60 = vadd.f32 %v1027_v46, %v2587_v12  ;;  %v2602_v53 = vadd.f32 %v1024_v11, %v2597_v6 }
 0xf30   :  { %v1037_v35 = vrot.slane %v2590_v60, 6  ;;  %v1030_v10 = vrot.slane %v2602_v53, 6 }
 0xf32   :  { %v1909_v13 = vpack.i.bf16 %v1037_v35, %v1032_v36  ;;  %v1041_v54 = vsel %vm164_vm3, %v2262_v8, %v1030_v10  ;;  %v1172_v10 = vmul.f32 %v2590_v60, %v2473_v18  ;;  %v1169_v18 = vmul.f32 %v2602_v53, %v2458_v45 }
 0xf34   :  { %1910 = vrot.lane.b32.xlu0 %v1909_v13, %s2089_s2 }
 0xfa6   :  { %v2605_v16 = vpop.permute.xlu0 %1910 }
 0xfa7   :  { %v1913_v32 = vunpack.i.h.bf16 %v2605_v16  ;;  %v1912_v23 = vunpack.i.l.bf16 %v2605_v16 }
 0xfa9   :  { %v1042_v25 = vsel %vm65_vm0, %v1041_v54, %v1912_v23 }
 0xfaa   :  { %v1043_v51 = vsel %vm167_vm4, %v1042_v25, %v1913_v32 }
 0xfab   :  { %v1045_v47 = vrot.slane %v1043_v51, 2 }
 0xfad   :  { %1112 = vmatmul.mubr.f32.vlgmr.msra.gmra.mrb[6].mxu0 %v1045_v47 }
 0xfae   :  { %1857 = vmatpush1.bf16.msra.mxu0 %v2198_v30  ;;  %1393 = vmatprep.mubr.f32.mxu0 %v2086_v9 }
 0xfaf   :  { %1859 = vmatprep.subr.bf16.mxu0 %v2201_v34 }
 0xfb2   :  { %1861 = vmatpush1.bf16.msra.mxu0 %v2205_v37 }
 0xfb3   :  { %1863 = vmatprep.subr.bf16.mxu0 %v2209_v38 }
 0xfb6   :  { %1865 = vmatpush1.bf16.msra.mxu0 %v2213_v43 }
 0xfb7   :  { %1867 = vmatprep.subr.bf16.mxu0 %v2217_v44 }
 0xfba   :  { %1869 = vmatpush1.bf16.msra.mxu0 %v2221_v49 }
 0xfbb   :  { %1871 = vmatprep.subr.bf16.mxu0 %v2225_v50 }
 0xfbe   :  { %1873 = vmatpush1.bf16.msra.mxu0 %v2229_v55 }
 0xfbf   :  { %1875 = vmatprep.subr.bf16.mxu0 %v2233_v56 }
 0xfc2   :  { %1877 = vmatpush1.bf16.msra.mxu0 %v2237_v61 }
 0xfc3   :  { %1879 = vmatprep.subr.bf16.mxu0 %v2241_v62 }
 0xfc6   :  { %1881 = vmatpush1.bf16.msra.mxu0 %v2245_v3 }
 0xfc7   :  { %1883 = vmatprep.subr.bf16.mxu0 %v2249_v4 }
 0xfca   :  { %1885 = vmatpush1.bf16.msra.mxu0 %v2253_v7 }
0x1080   :  { %v1113_v9 = vpop.f32.mrb[6].mxu0 }
0x1081   :  { %v1114_v30 = vadd.f32 %v1113_v9, %v2304_v27  ;;  %v1115_v34 = vpop.f32.mrb[7].mxu0 }
0x1082   :  { %v1116_v37 = vadd.f32 %v1115_v34, %v2307_v28 }
0x1083   :  { %1125 = vrot.lane.b32.xlu0 %v1114_v30, %s2087_s12  ;;  %v1579_v38 = vmul.f32 -1.442695, %v1114_v30 }
0x1084   :  { %1150 = vrot.lane.b32.xlu1 %v1116_v37, %s2087_s12  ;;  %v1580_v43 = vmul.f32 -1.442695, %v1116_v37 }
0x1085   :  { %1974 = vpow2.f32 %v1579_v38 }
0x1086   :  { %1976 = vpow2.f32 %v1580_v43 }
0x108f   :  { %v1975_v44 = vpop.eup %1974 }
0x1090   :  { %v1977_v49 = vpop.eup %1976  ;;  %v1121_v50 = vadd.f32 1.0, %v1975_v44 }
0x1091   :  { %v1146_v55 = vadd.f32 1.0, %v1977_v49 }
0x1092   :  { %1978 = vrcp.f32 %v1121_v50 }
0x1093   :  { %1980 = vrcp.f32 %v1146_v55 }
0x109c   :  { %v1979_v56 = vpop.eup %1978 }
0x109d   :  { %v1981_v62 = vpop.eup %1980  ;;  %v1135_v47 = vsub.f32 1.0, %v1979_v56 }
0x109e   :  { %v1160_v39 = vsub.f32 1.0, %v1981_v62  ;;  %v1166_v17 = vmul.f32 %v1981_v62, %v2590_v60 }
0x10f5   :  { %v1126_v61 = vpop.permute.xlu0 %1125 }
0x10f6   :  { %v1128_v3 = vmul.f32 %v1979_v56, %v1126_v61  ;;  %v1151_v4 = vpop.permute.xlu1 %1150 }
0x10f7   :  { %v1153_v7 = vmul.f32 %v1981_v62, %v1151_v4 }
0x10f8   :  { %1130 = vrot.lane.b32.xlu0 %v1128_v3, %s2089_s2 }
0x10f9   :  { %1155 = vrot.lane.b32.xlu1 %v1153_v7, %s2089_s2 }
0x116a   :  { %v1131_v26 = vpop.permute.xlu0 %1130 }
0x116b   :  { %v1133_v46 = vadd.f32 %v1131_v26, %v1114_v30  ;;  %v1156_v36 = vpop.permute.xlu1 %1155  ;;  %v1141_v30 = vmul.f32 %v1979_v56, %v2602_v53 }
0x116c   :  { %v1158_v35 = vadd.f32 %v1156_v36, %v1116_v37 }
0x116d   :  { %1982 = vtanh.f32 %v1133_v46 }
0x116e   :  { %1984 = vtanh.f32 %v1158_v35 }
0x1177   :  { %v1983_v13 = vpop.eup %1982 }
0x1178   :  { %v1985_v1 = vpop.eup %1984  ;;  %1137 = vrot.lane.b32.xlu0 %v1983_v13, %s2088_s14 }
0x1179   :  { %1162 = vrot.lane.b32.xlu1 %v1985_v1, %s2088_s14 }
0x11ea   :  { %v1138_v51 = vpop.permute.xlu0 %1137 }
0x11eb   :  { %v1163_v29 = vpop.permute.xlu1 %1162  ;;  %v1140_v9 = vmul.f32 %v1138_v51, %v1135_v47 }
0x11ec   :  { %v1165_v31 = vmul.f32 %v1163_v29, %v1160_v39 }
0x11ed   :  { %v1142_v34 = vadd.f32 %v1141_v30, %v1140_v9 }
0x11ee   :  { %v1167_v11 = vadd.f32 %v1166_v17, %v1165_v31 }
0x11ef   :  { %v2649_v37 = vmul.f32 %v1142_v34, %v2455_v14 }
0x11f0   :  { %v2643_v32 = vmul.f32 %v1167_v11, %v2470_v63 }
0x11f1   :  { %v1170_v63 = vadd.f32 %v1169_v18, %v2649_v37 }
0x11f2   :  { %v1173_v54 = vadd.f32 %v1172_v10, %v2643_v32 }
0x11f3   :  { %v1175_v60 = vrot.slane %v1170_v63, 4 }
0x11f4   :  { %v1178_v25 = vrot.slane %v1173_v54, 4  ;;  %v1313_v9 = vmul.f32 %v1173_v54, %v2410_v19 }
0x11f5   :  { %v1182_v38 = vsel %vm164_vm3, %v2262_v8, %v1175_v60 }
0x11f6   :  { %1179 = vrot.lane.b32.xlu1 %v1178_v25, %s2089_s2  ;;  %v1183_v44 = vsel %vm65_vm0, %v1182_v38, %v1907_v42 }
0x1268   :  { %v1180_v43 = vpop.permute.xlu1 %1179 }
0x1269   :  { %v1184_v49 = vsel %vm167_vm4, %v1183_v44, %v1180_v43 }
0x126a   :  { %v1186_v50 = vrot.slane %v1184_v49, 4 }
0x126c   :  { %1253 = vmatmul.mubr.f32.vlgmr.msra.gmra.mrb[6].mxu1 %v1186_v50 }
0x133f   :  { %v1254_v14 = vpop.f32.mrb[6].mxu1 }
0x1340   :  { %v1255_v55 = vadd.f32 %v1254_v14, %v2304_v27  ;;  %v1256_v56 = vpop.f32.mrb[7].mxu1  ;;  %v1310_v14 = vmul.f32 %v1170_v63, %v2395_v57 }
0x1341   :  { %v1257_v45 = vadd.f32 %v1256_v56, %v2307_v28 }
0x1342   :  { %1266 = vrot.lane.b32.xlu1 %v1255_v55, %s2087_s12  ;;  %v1581_v53 = vmul.f32 -1.442695, %v1255_v55 }
0x1343   :  { %1291 = vrot.lane.b32.xlu0 %v1257_v45, %s2087_s12  ;;  %v1582_v61 = vmul.f32 -1.442695, %v1257_v45 }
0x1344   :  { %1986 = vpow2.f32 %v1581_v53 }
0x1345   :  { %1988 = vpow2.f32 %v1582_v61 }
0x134e   :  { %v1987_v24 = vpop.eup %1986 }
0x134f   :  { %v1989_v42 = vpop.eup %1988  ;;  %v1262_v62 = vadd.f32 1.0, %v1987_v24 }
0x1350   :  { %v1287_v3 = vadd.f32 1.0, %v1989_v42 }
0x1351   :  { %1990 = vrcp.f32 %v1262_v62 }
0x1352   :  { %1992 = vrcp.f32 %v1287_v3 }
0x135b   :  { %v1991_v4 = vpop.eup %1990 }
0x135c   :  { %v1993_v26 = vpop.eup %1992  ;;  %v1276_v38 = vsub.f32 1.0, %v1991_v4  ;;  %v1282_v44 = vmul.f32 %v1991_v4, %v1170_v63 }
0x135d   :  { %v1301_v11 = vsub.f32 1.0, %v1993_v26  ;;  %v1307_v25 = vmul.f32 %v1993_v26, %v1173_v54 }
0x13b4   :  { %v1267_v7 = vpop.permute.xlu1 %1266 }
0x13b5   :  { %v1269_v46 = vmul.f32 %v1991_v4, %v1267_v7  ;;  %v1292_v36 = vpop.permute.xlu0 %1291 }
0x13b6   :  { %v1294_v35 = vmul.f32 %v1993_v26, %v1292_v36 }
0x13b7   :  { %1271 = vrot.lane.b32.xlu1 %v1269_v46, %s2089_s2 }
0x13b8   :  { %1296 = vrot.lane.b32.xlu0 %v1294_v35, %s2089_s2 }
0x1429   :  { %v1272_v13 = vpop.permute.xlu1 %1271 }
0x142a   :  { %v1274_v1 = vadd.f32 %v1272_v13, %v1255_v55  ;;  %v1297_v39 = vpop.permute.xlu0 %1296 }
0x142b   :  { %v1299_v29 = vadd.f32 %v1297_v39, %v1257_v45 }
0x142c   :  { %1994 = vtanh.f32 %v1274_v1 }
0x142d   :  { %1996 = vtanh.f32 %v1299_v29  ;;  %v1470_v29 = vadd.f32 %v2643_v32, %v2478_v20  ;;  %v1491_v20 = vadd.f32 %v2649_v37, %v2463_v52 }
0x1436   :  { %v1995_v17 = vpop.eup %1994 }
0x1437   :  { %v1997_v31 = vpop.eup %1996  ;;  %1278 = vrot.lane.b32.xlu1 %v1995_v17, %s2088_s14 }
0x1438   :  { %1303 = vrot.lane.b32.xlu0 %v1997_v31, %s2088_s14  ;;  %v1484_v31 = vadd.f32 %v2597_v6, %v2527_v2 }
0x14a9   :  { %v1279_v60 = vpop.permute.xlu1 %1278 }
0x14aa   :  { %v1304_v10 = vpop.permute.xlu0 %1303  ;;  %v1281_v43 = vmul.f32 %v1279_v60, %v1276_v38 }
0x14ab   :  { %v1306_v51 = vmul.f32 %v1304_v10, %v1301_v11  ;;  %v1477_v11 = vadd.f32 %v2587_v12, %v2543_v33 }
0x14ac   :  { %v1283_v49 = vadd.f32 %v1282_v44, %v1281_v43 }
0x14ad   :  { %v1308_v47 = vadd.f32 %v1307_v25, %v1306_v51 }
0x14ae   :  { %v1309_v50 = vmul.f32 %v1283_v49, %v2392_v48 }
0x14af   :  { %v1312_v30 = vmul.f32 %v1308_v47, %v2407_v5 }
0x14b0   :  { %v2676_v55 = vadd.f32 %v1310_v14, %v1309_v50  ;;  %v1498_v10 = vadd.f32 %v1309_v50, %v2400_v0 }
0x14b1   :  { %v2670_v34 = vadd.f32 %v1313_v9, %v1312_v30  ;;  %v1463_v17 = vadd.f32 %v1312_v30, %v2415_v21 }
0x14b2   :  { %v1316_v19 = vrot.slane %v2676_v55, 2 }
0x14b3   :  { %v1319_v18 = vrot.slane %v2670_v34, 2 }
0x14b4   :  { %v1323_v5 = vsel %vm164_vm3, %v2262_v8, %v1316_v19 }
0x14b5   :  { %1320 = vrot.lane.b32.xlu0 %v1319_v18, %s2089_s2  ;;  %v1324_v56 = vsel %vm65_vm0, %v1323_v5, %v1912_v23 }
0x1527   :  { %v1321_v54 = vpop.permute.xlu0 %1320 }
0x1528   :  { %v1325_v45 = vsel %vm167_vm4, %v1324_v56, %v1321_v54 }
0x1529   :  { %v1327_v53 = vrot.slane %v1325_v45, 6 }
0x152b   :  { %1394 = vmatmul.mubr.f32.vlgmr.msra.gmra.mrb[8].mxu0 %v1327_v53 }
0x15fe   :  { %v1395_v61 = vpop.f32.mrb[8].mxu0 }
0x15ff   :  { %v1396_v48 = vadd.f32 %v1395_v61, %v2304_v27  ;;  %v1397_v57 = vpop.f32.mrb[9].mxu0 }
0x1600   :  { %v1398_v63 = vadd.f32 %v1397_v57, %v2307_v28 }
0x1601   :  { %1407 = vrot.lane.b32.xlu1 %v1396_v48, %s2087_s12  ;;  %v1583_v8 = vmul.f32 -1.442695, %v1396_v48 }
0x1602   :  { %1432 = vrot.lane.b32.xlu0 %v1398_v63, %s2087_s12  ;;  %v1584_v24 = vmul.f32 -1.442695, %v1398_v63 }
0x1603   :  { %1998 = vpow2.f32 %v1583_v8 }
0x1604   :  { %2000 = vpow2.f32 %v1584_v24 }
0x160d   :  { %v1999_v16 = vpop.eup %1998 }
0x160e   :  { %v2001_v23 = vpop.eup %2000  ;;  %v1403_v42 = vadd.f32 1.0, %v1999_v16 }
0x160f   :  { %v1428_v62 = vadd.f32 1.0, %v2001_v23 }
0x1610   :  { %2002 = vrcp.f32 %v1403_v42 }
0x1611   :  { %2004 = vrcp.f32 %v1428_v62 }
0x161a   :  { %v2003_v3 = vpop.eup %2002 }
0x161b   :  { %v2005_v27 = vpop.eup %2004  ;;  %v1417_v21 = vsub.f32 1.0, %v2003_v3  ;;  %v1423_v2 = vmul.f32 %v2003_v3, %v2676_v55 }
0x161c   :  { %v1442_v25 = vsub.f32 1.0, %v2005_v27  ;;  %v1448_v12 = vmul.f32 %v2005_v27, %v2670_v34 }
0x1673   :  { %v1408_v4 = vpop.permute.xlu1 %1407 }
0x1674   :  { %v1410_v7 = vmul.f32 %v2003_v3, %v1408_v4  ;;  %v1433_v26 = vpop.permute.xlu0 %1432 }
0x1675   :  { %v1435_v28 = vmul.f32 %v2005_v27, %v1433_v26 }
0x1676   :  { %1412 = vrot.lane.b32.xlu1 %v1410_v7, %s2089_s2 }
0x1677   :  { %1437 = vrot.lane.b32.xlu0 %v1435_v28, %s2089_s2 }
0x16e8   :  { %v1413_v46 = vpop.permute.xlu1 %1412 }
0x16e9   :  { %v1415_v36 = vadd.f32 %v1413_v46, %v1396_v48  ;;  %v1438_v35 = vpop.permute.xlu0 %1437 }
0x16ea   :  { %v1440_v13 = vadd.f32 %v1438_v35, %v1398_v63 }
0x16eb   :  { %2006 = vtanh.f32 %v1415_v36 }
0x16ec   :  { %2008 = vtanh.f32 %v1440_v13 }
0x16f5   :  { %v2007_v1 = vpop.eup %2006 }
0x16f6   :  { %v2009_v39 = vpop.eup %2008  ;;  %1419 = vrot.lane.b32.xlu1 %v2007_v1, %s2088_s14 }
0x16f7   :  { %1444 = vrot.lane.b32.xlu0 %v2009_v39, %s2088_s14 }
0x16fa   :  { %1472 = vrot.lane.b32.xlu1 %v1470_v29, %s2088_s14 }
0x16fb   :  { %1465 = vrot.lane.b32.xlu0 %v1463_v17, %s2088_s14 }
0x16fe   :  { %1486 = vrot.lane.b32.xlu1 %v1484_v31, %s2088_s14 }
0x16ff   :  { %1479 = vrot.lane.b32.xlu0 %v1477_v11, %s2088_s14 }
0x1702   :  { %1500 = vrot.lane.b32.xlu1 %v1498_v10, %s2088_s14 }
0x1703   :  { %1493 = vrot.lane.b32.xlu0 %v1491_v20, %s2088_s14 }
0x1768   :  { %v1420_v32 = vpop.permute.xlu1 %1419 }
0x1769   :  { %v1422_v6 = vmul.f32 %v1420_v32, %v1417_v21  ;;  %v1445_v33 = vpop.permute.xlu0 %1444 }
0x176a   :  { %v1447_v51 = vmul.f32 %v1445_v33, %v1442_v25 }
0x176b   :  { %v1424_v47 = vadd.f32 %v1423_v2, %v1422_v6 }
0x176c   :  { %v1449_v0 = vadd.f32 %v1448_v12, %v1447_v51  ;;  %v1473_v9 = vpop.permute.xlu1 %1472 }
0x176d   :  { %v1450_v52 = vmul.f32 %v1424_v47, %v2332_v15  ;;  %1476 = vst.msk [vmem:[#allocation5 + $0x4] sm:$0x3] %vm1461_vm13, %v1473_v9  ;;  %v1466_v37 = vpop.permute.xlu0 %1465  ;;  %v1454_v15 = vmul.f32 %v2670_v34, %v2322_v59 }
0x176e   :  { %v1453_v30 = vmul.f32 %v1449_v0, %v2344_v40  ;;  %1469 = vst.msk [vmem:[#allocation5 + $0x2] sm:$0x3] %vm1461_vm13, %v1466_v37  ;;  %v1451_v40 = vmul.f32 %v2676_v55, %v2320_v58 }
0x176f   :  { %v1505_v18 = vadd.f32 %v1450_v52, %v2335_v22 }
0x1770   :  { %v1487_v60 = vpop.permute.xlu1 %1486  ;;  %v1456_v38 = vadd.f32 %v1453_v30, %v2347_v41  ;;  %v1455_v44 = vadd.f32 %v1454_v15, %v1453_v30  ;;  %v1452_v49 = vadd.f32 %v1451_v40, %v1450_v52 }
0x1771   :  { %1490 = vst.msk [vmem:[#allocation5 + $0x8] sm:$0x3] %vm1461_vm13, %v1487_v60  ;;  %v1480_v43 = vpop.permute.xlu0 %1479  ;;  %1507 = vrot.lane.b32.xlu0 %v1505_v18, %s2088_s14 }
0x1772   :  { %1483 = vst.msk [vmem:[#allocation5 + $0x6] sm:$0x3] %vm1461_vm13, %v1480_v43  ;;  %1458 = vrot.lane.b32.xlu1 %v1456_v38, %s2088_s14 }
0x1774   :  { %v1501_v22 = vpop.permute.xlu1 %1500 }
0x1775   :  { %1504 = vst.msk [vmem:[#allocation5 + $0xc] sm:$0x3] %vm1461_vm13, %v1501_v22  ;;  %v1494_v41 = vpop.permute.xlu0 %1493  ;;  %1518 = vrot.lane.b32.xlu0 %v1455_v44, %s2088_s14 }
0x1776   :  { %1497 = vst.msk [vmem:[#allocation5 + $0xa] sm:$0x3] %vm1461_vm13, %v1494_v41  ;;  %1513 = vrot.lane.b32.xlu1 %v1452_v49, %s2088_s14 }
0x17e3   :  { %v1508_v59 = vpop.permute.xlu0 %1507 }
0x17e4   :  { %1511 = vst.msk [vmem:[#allocation5 + $0xe] sm:$0x3] %vm1461_vm13, %v1508_v59  ;;  %v1459_v34 = vpop.permute.xlu1 %1458 }
0x17e5   :  { %1462 = vst.msk [vmem:[#allocation5] sm:$0x3] %vm1461_vm13, %v1459_v34 }
0x17e6   :  { %2043 = shalt.err (!%p2040_p12)
}
0x17e7   :  { %s2044_s23 = scalar_lea.hbm %s2767_s6, 256 }
0x17e8   :  { %p2045_p13 = scmp.ne.s32.totalorder %s2767_s6, %s2044_s23  ;;  %p2048_p0 = scmp.lt.u32.totalorder %s2044_s23, %s2767_s6 }
0x17ea   :  { %p2050_p1 = pnand %p2048_p0, %p2045_p13 }
0x17ec   :  { %2053 = shalt.err (!%p2050_p1)
}
0x17ed   :  { %s2092_s28 = smov 2   ;;  %v1519_v58 = vpop.permute.xlu0 %1518  ;;  %v1514_v50 = vpop.permute.xlu1 %1513  ;;  %s2054_s0 = scalar_lea.vmem %s1541_s20, 64 }
0x17ee   :  { %1534 = dma.vmem_to_hbm [thread:$0]  %s1529_s5, 256, %s2767_s6, [#allocation4], %s2087_s12, %s2087_s12, %s2092_s28   ;;  %1522 = vst.msk [vmem:[#allocation6 + $0x2] sm:$0x3] %vm1461_vm13, %v1519_v58  ;;  %1516 = vst.msk [vmem:[#allocation6] sm:$0x3] %vm1461_vm13, %v1514_v50 }
0x17ef   :  { %p2055_p2 = scmp.ne.s32.totalorder %s1541_s20, %s2054_s0  ;;  %p2059_p3 = scmp.lt.s32.totalorder %s1541_s20, %s1541_s20 }
0x17f0   :  { %p2060_p4 = scmp.lt.s32.totalorder %s2054_s0, %s2054_s0 }
0x17f2   :  { %p2061_p5 = por %p2060_p4, %p2059_p3 }
0x17f4   :  { %p2062_p6 = pnand %p2061_p5, %p2055_p2 }
0x17f6   :  { %2065 = shalt.err (!%p2062_p6)
}
0x17f7   :  { %s2066_s10 = scalar_lea.hbm %s2768_s7, 64 }
0x17f8   :  { %p2067_p7 = scmp.ne.s32.totalorder %s2768_s7, %s2066_s10  ;;  %p2070_p8 = scmp.lt.u32.totalorder %s2066_s10, %s2768_s7 }
0x17fa   :  { %p2072_p9 = pnand %p2070_p8, %p2067_p7 }
0x17fc   :  { %2075 = shalt.err (!%p2072_p9)
}
0x17fd   :  { %1546 = dma.vmem_to_hbm [thread:$0]  %s1541_s20, 64, %s2768_s7, [#allocation7], %s2087_s12, %s2087_s12, %s2092_s28  }
0x17fe   :  { %2078 = dma.done.wait [#allocation4], 256  }
0x17ff   :  { %2079 = vsyncadd [#allocation4], 4294967040 }
0x1800   :  { %2080 = dma.done.wait [#allocation7], 64  }
0x1801   :  { %2081 = vsyncadd [#allocation7], 4294967232 }
0x1802   :  { %1553 = vsyncpa [#allocation3], 1 }
0x1803   :  { %1554 = vsyncpa [#allocation4], 1 }
0x1804   :  { %1555 = vsyncpa [#allocation7], 1 }

</bundles_post_ra>
